<compile_context>
chip_gen: v5e
topology: v5e:2x2
jax: 0.10.0
libtpu: 0.0.40
codegen_flags: <defaults>
</compile_context>

<pallas_src>
import functools
import math

import jax
import jax.numpy as jnp
from jax.experimental import pallas as pl
from jax.experimental.pallas import tpu as pltpu


# ----------------------------------------------------------------------------
# Tiling helper
# ----------------------------------------------------------------------------

def _pick_tile(dim, target, align):
    """Largest multiple of `align` <= target that evenly divides dim; else full dim."""
    if dim <= target:
        return dim
    if dim % align:
        return dim  # TODO(synk): pad-to-multiple fallback for odd (e.g. vocab) axes.
    t = (min(target, dim) // align) * align
    while t >= align:
        if dim % t == 0:
            return t
        t -= align
    return dim


# ----------------------------------------------------------------------------
# Tiled matmul (final vocab projection)
# ----------------------------------------------------------------------------

def _mm_kernel(x_ref, w_ref, o_ref, acc_ref):
    @pl.when(pl.program_id(2) == 0)
    def _():
        acc_ref[...] = jnp.zeros_like(acc_ref)

    acc_ref[...] += jnp.dot(x_ref[...], w_ref[...],
                            preferred_element_type=jnp.float32)

    @pl.when(pl.program_id(2) == pl.num_programs(2) - 1)
    def _():
        o_ref[...] = acc_ref[...].astype(o_ref.dtype)


def pallas_matmul(x, w, out_dtype=jnp.float32, tm=256, tn=256, tk=512):
    """Tiled (M,N,K) matmul; x/w should be bf16, accumulation in f32."""
    M, K = x.shape
    K2, N = w.shape
    assert K == K2
    tm = _pick_tile(M, tm, 16)   # bf16 packs 2 rows / sublane
    tn = _pick_tile(N, tn, 128)
    tk = _pick_tile(K, tk, 128)
    grid = (M // tm, N // tn, K // tk)
    return pl.pallas_call(
        _mm_kernel,
        grid=grid,
        in_specs=[pl.BlockSpec((tm, tk), lambda i, j, k: (i, k)),
                  pl.BlockSpec((tk, tn), lambda i, j, k: (k, j))],
        out_specs=pl.BlockSpec((tm, tn), lambda i, j, k: (i, j)),
        out_shape=jax.ShapeDtypeStruct((M, N), out_dtype),
        scratch_shapes=[pltpu.VMEM((tm, tn), jnp.float32)],
        compiler_params=pltpu.CompilerParams(
            dimension_semantics=("parallel", "parallel", "arbitrary")),
    )(x, w)


# ----------------------------------------------------------------------------
# Fused multi-head attention block (QKV proj -> attention -> W_O + residual + LN)
# ----------------------------------------------------------------------------

def _mha_block_kernel(xq_ref, xkv_ref, bias_ref, wq_ref, wkv_ref, wo_ref,
                      g_ref, b_ref, out_ref, attn_ref, *, n_heads, d_k, d_v, eps):
    xq_f32 = xq_ref[0]                                  # (Lq, D) f32, residual
    xq = xq_f32.astype(jnp.bfloat16)
    xkv = xkv_ref[0].astype(jnp.bfloat16)               # (Lk, D)

    # Projections (W_Q already carries the 1/sqrt(d_k) scale).
    q = jnp.dot(xq, wq_ref[...],
                preferred_element_type=jnp.float32).astype(jnp.bfloat16)   # (Lq, H*dk)
    kv = jnp.dot(xkv, wkv_ref[...], preferred_element_type=jnp.float32)    # (Lk, H*(dk+dv))
    k = kv[:, :n_heads * d_k].astype(jnp.bfloat16)
    v = kv[:, n_heads * d_k:].astype(jnp.bfloat16)

    bias = bias_ref[0].astype(jnp.float32)               # (Lq, Lk) additive, 0 / -1e9

    ctx_parts = []
    for h in range(n_heads):                              # static unroll over heads
        qh = q[:, h * d_k:(h + 1) * d_k]                   # (Lq, dk)
        kh = k[:, h * d_k:(h + 1) * d_k]                   # (Lk, dk)
        vh = v[:, h * d_v:(h + 1) * d_v]                   # (Lk, dv)
        s = jax.lax.dot_general(qh, kh, (((1,), (1,)), ((), ())),
                                preferred_element_type=jnp.float32)         # (Lq, Lk)
        s = s + bias
        smax = jnp.max(s, axis=-1, keepdims=True)
        e = jnp.exp(s - smax)
        denom = jnp.sum(e, axis=-1, keepdims=True)
        p = e * pl.reciprocal(denom, approx=True)
        attn_ref[0, h, :, :] = p.astype(attn_ref.dtype)
        ctx_parts.append(jnp.dot(p.astype(jnp.bfloat16), vh,
                                 preferred_element_type=jnp.float32))        # (Lq, dv)

    ctx = jnp.concatenate(ctx_parts, axis=-1).astype(jnp.bfloat16)           # (Lq, H*dv)

    # Output projection + residual + LayerNorm (all in f32).
    y = jnp.dot(ctx, wo_ref[...], preferred_element_type=jnp.float32) + xq_f32
    mu = jnp.mean(y, axis=-1, keepdims=True)
    var = jnp.mean((y - mu) ** 2, axis=-1, keepdims=True)
    out_ref[0] = ((y - mu) * jax.lax.rsqrt(var + eps)
                  * g_ref[...] + b_ref[...]).astype(out_ref.dtype)


def pallas_mha_block(x_q, x_kv, bias, w_q_scaled, w_kv, w_o, gamma, beta,
                     n_heads, d_k, d_v, eps=1e-5):
    """One fused kernel per batch element: projections, attention, W_O, residual, LN."""
    B, Lq, D = x_q.shape
    Lk = x_kv.shape[1]
    kernel = functools.partial(_mha_block_kernel,
                               n_heads=n_heads, d_k=d_k, d_v=d_v, eps=eps)
    out, attn = pl.pallas_call(
        kernel,
        grid=(B,),
        in_specs=[pl.BlockSpec((1, Lq, D), lambda b: (b, 0, 0)),
                  pl.BlockSpec((1, Lk, D), lambda b: (b, 0, 0)),
                  pl.BlockSpec((1, Lq, Lk), lambda b: (b, 0, 0)),
                  pl.BlockSpec((D, n_heads * d_k), lambda b: (0, 0)),
                  pl.BlockSpec((D, n_heads * (d_k + d_v)), lambda b: (0, 0)),
                  pl.BlockSpec((n_heads * d_v, D), lambda b: (0, 0)),
                  pl.BlockSpec((1, D), lambda b: (0, 0)),
                  pl.BlockSpec((1, D), lambda b: (0, 0))],
        out_specs=(pl.BlockSpec((1, Lq, D), lambda b: (b, 0, 0)),
                   pl.BlockSpec((1, n_heads, Lq, Lk), lambda b: (b, 0, 0, 0))),
        out_shape=(jax.ShapeDtypeStruct((B, Lq, D), jnp.float32),
                   jax.ShapeDtypeStruct((B, n_heads, Lq, Lk), jnp.float32)),
        compiler_params=pltpu.CompilerParams(
            dimension_semantics=("parallel",)),
    )(x_q, x_kv, bias, w_q_scaled, w_kv, w_o,
      gamma.reshape(1, D), beta.reshape(1, D))
    return out, attn


# ----------------------------------------------------------------------------
# Fused FFN (matmul -> ReLU -> matmul) + residual + LayerNorm
# ----------------------------------------------------------------------------

def _ffn_res_ln_kernel(x_ref, w1_ref, w2_ref, res_ref, g_ref, b_ref,
                       o_ref, acc_ref, *, eps):
    @pl.when(pl.program_id(1) == 0)
    def _():
        acc_ref[...] = jnp.zeros_like(acc_ref)

    h = jnp.dot(x_ref[...], w1_ref[...], preferred_element_type=jnp.float32)
    h = jnp.maximum(h, 0.0).astype(w2_ref.dtype)
    acc_ref[...] += jnp.dot(h, w2_ref[...], preferred_element_type=jnp.float32)

    @pl.when(pl.program_id(1) == pl.num_programs(1) - 1)
    def _():
        y = acc_ref[...] + res_ref[...]
        mu = jnp.mean(y, axis=-1, keepdims=True)
        var = jnp.mean((y - mu) ** 2, axis=-1, keepdims=True)
        o_ref[...] = ((y - mu) * jax.lax.rsqrt(var + eps)
                      * g_ref[...] + b_ref[...]).astype(o_ref.dtype)


def pallas_ffn_res_ln(x, w1, w2, res, gamma, beta, eps=1e-5, tm=256, tf=512):
    """Fused relu(x @ W1) @ W2 + residual + LayerNorm; hidden dim F tiled/accumulated."""
    M, D = x.shape
    D2, F = w1.shape
    assert D == D2 and w2.shape == (F, D) and res.shape == (M, D)
    tm = _pick_tile(M, tm, 16)
    tf = _pick_tile(F, tf, 128)
    grid = (M // tm, F // tf)
    kernel = functools.partial(_ffn_res_ln_kernel, eps=eps)
    return pl.pallas_call(
        kernel,
        grid=grid,
        in_specs=[pl.BlockSpec((tm, D), lambda i, f: (i, 0)),
                  pl.BlockSpec((D, tf), lambda i, f: (0, f)),
                  pl.BlockSpec((tf, D), lambda i, f: (f, 0)),
                  pl.BlockSpec((tm, D), lambda i, f: (i, 0)),
                  pl.BlockSpec((1, D), lambda i, f: (0, 0)),
                  pl.BlockSpec((1, D), lambda i, f: (0, 0))],
        out_specs=pl.BlockSpec((tm, D), lambda i, f: (i, 0)),
        out_shape=jax.ShapeDtypeStruct((M, D), jnp.float32),
        scratch_shapes=[pltpu.VMEM((tm, D), jnp.float32)],
        compiler_params=pltpu.CompilerParams(
            dimension_semantics=("parallel", "arbitrary")),
    )(x, w1, w2, res, gamma.reshape(1, D), beta.reshape(1, D))


# ----------------------------------------------------------------------------
# Model glue (plain JAX): embeddings, positional encoding, masks, layer wiring
# ----------------------------------------------------------------------------

def sinusoid_pos_encoding(max_len, d_model):
    pos = jnp.arange(max_len, dtype=jnp.float32)[:, None]
    i = jnp.arange(d_model, dtype=jnp.float32)[None, :]
    angle = pos / jnp.power(10000.0, (2.0 * jnp.floor(i / 2.0)) / d_model)
    pe = jnp.where(jnp.mod(jnp.arange(d_model), 2) == 0,
                   jnp.sin(angle), jnp.cos(angle))
    return pe.astype(jnp.float32)


def get_attn_pad_mask(seq_q, seq_k):
    B, Lq = seq_q.shape
    Lk = seq_k.shape[1]
    pad = (seq_k == 0)[:, None, :]                     # (B, 1, Lk)
    return jnp.broadcast_to(pad, (B, Lq, Lk))


def get_attn_subsequent_mask(seq):
    B, L = seq.shape
    sub = jnp.triu(jnp.ones((L, L), dtype=jnp.bool_), k=1)
    return jnp.broadcast_to(sub[None, :, :], (B, L, L))


def mask_to_bias(mask):
    """Boolean mask (True == masked) -> compact additive bf16 bias (0 / -1e9)."""
    return jnp.where(mask, jnp.float32(-1e9), jnp.float32(0.0)).astype(jnp.bfloat16)


def multi_head_attention(x_q, x_kv, bias, p, n_heads, d_k, d_v):
    """Single fused pallas_call: QKV proj -> per-head attention -> W_O + residual + LN."""
    scale = 1.0 / math.sqrt(d_k)
    w_q_scaled = (p['W_Q'] * scale).astype(jnp.bfloat16)          # fold 1/sqrt(d_k) into W_Q
    w_kv = jnp.concatenate([p['W_K'], p['W_V']], axis=1).astype(jnp.bfloat16)
    w_o = p['W_O'].astype(jnp.bfloat16)
    out, attn = pallas_mha_block(x_q, x_kv, bias, w_q_scaled, w_kv, w_o,
                                 p['ln_g'], p['ln_b'], n_heads, d_k, d_v)
    return out, attn


def poswise_ffn(x, p):
    B, L, d_model = x.shape
    x2 = x.reshape(B * L, d_model)
    out = pallas_ffn_res_ln(x2.astype(jnp.bfloat16),
                            p['W1'].astype(jnp.bfloat16),
                            p['W2'].astype(jnp.bfloat16),
                            x2, p['ln_g'], p['ln_b'])
    return out.reshape(B, L, d_model)


def encoder(enc_inputs, params, cfg):
    B, Ls = enc_inputs.shape
    x = params['src_emb'][enc_inputs]                       # (B, Ls, d_model)
    x = x + params['pos_enc'][:Ls][None, :, :]
    self_bias = mask_to_bias(get_attn_pad_mask(enc_inputs, enc_inputs))
    attns = []
    for lp in params['enc_layers']:
        x, a = multi_head_attention(x, x, self_bias, lp['mha'],
                                    cfg['n_heads'], cfg['d_k'], cfg['d_v'])
        x = poswise_ffn(x, lp['ffn'])
        attns.append(a)
    return x, attns


def decoder(dec_inputs, enc_inputs, enc_outputs, params, cfg):
    B, Lt = dec_inputs.shape
    x = params['tgt_emb'][dec_inputs]                       # (B, Lt, d_model)
    x = x + params['pos_enc'][:Lt][None, :, :]
    self_pad = get_attn_pad_mask(dec_inputs, dec_inputs)
    self_sub = get_attn_subsequent_mask(dec_inputs)
    self_bias = mask_to_bias(jnp.logical_or(self_pad, self_sub))
    # NOTE: the reference module calls decode(dec_inputs, dec_inputs, enc_outputs),
    # so the dec-enc pad mask is derived from dec_inputs (faithful reproduction).
    dec_enc_bias = mask_to_bias(get_attn_pad_mask(dec_inputs, enc_inputs))
    self_attns, dec_enc_attns = [], []
    for lp in params['dec_layers']:
        x, a1 = multi_head_attention(x, x, self_bias, lp['self_mha'],
                                     cfg['n_heads'], cfg['d_k'], cfg['d_v'])
        x, a2 = multi_head_attention(x, enc_outputs, dec_enc_bias, lp['cross_mha'],
                                     cfg['n_heads'], cfg['d_k'], cfg['d_v'])
        x = poswise_ffn(x, lp['ffn'])
        self_attns.append(a1)
        dec_enc_attns.append(a2)
    return x, self_attns, dec_enc_attns


def transformer_forward(enc_inputs, dec_inputs, params, cfg):
    enc_outputs, enc_self_attns = encoder(enc_inputs, params, cfg)
    # Reproduce the original call: self.decode(dec_inputs, dec_inputs, enc_outputs)
    dec_outputs, dec_self_attns, dec_enc_attns = decoder(
        dec_inputs, dec_inputs, enc_outputs, params, cfg)
    B, Lt, d_model = dec_outputs.shape
    dec_logits = pallas_matmul(dec_outputs.reshape(B * Lt, d_model).astype(jnp.bfloat16),
                               params['proj'].astype(jnp.bfloat16),
                               out_dtype=jnp.float32)        # (B*Lt, tgt_vocab)
    return dec_logits, enc_self_attns, dec_self_attns, dec_enc_attns


# ----------------------------------------------------------------------------
# Deterministic parameter construction
# ----------------------------------------------------------------------------

def init_params(key, cfg):
    d_model, d_k, d_v, d_ff = cfg['d_model'], cfg['d_k'], cfg['d_v'], cfg['d_ff']
    H = cfg['n_heads']

    def nxt():
        nonlocal key
        key, sub = jax.random.split(key)
        return sub

    def dense(shape, scale=0.02):
        return (scale * jax.random.normal(nxt(), shape)).astype(jnp.float32)

    def mha_params():
        return {'W_Q': dense((d_model, H * d_k)),
                'W_K': dense((d_model, H * d_k)),
                'W_V': dense((d_model, H * d_v)),
                'W_O': dense((H * d_v, d_model)),
                'ln_g': jnp.ones((d_model,), jnp.float32),
                'ln_b': jnp.zeros((d_model,), jnp.float32)}

    def ffn_params():
        return {'W1': dense((d_model, d_ff)),
                'W2': dense((d_ff, d_model)),
                'ln_g': jnp.ones((d_model,), jnp.float32),
                'ln_b': jnp.zeros((d_model,), jnp.float32)}

    params = {
        'src_emb': jax.random.normal(nxt(), (cfg['src_vocab'], d_model)).astype(jnp.float32),
        'tgt_emb': jax.random.normal(nxt(), (cfg['tgt_vocab'], d_model)).astype(jnp.float32),
        'pos_enc': sinusoid_pos_encoding(cfg['max_len'], d_model),
        'proj': dense((d_model, cfg['tgt_vocab'])),
        'enc_layers': [{'mha': mha_params(), 'ffn': ffn_params()}
                       for _ in range(cfg['en_n_layers'])],
        'dec_layers': [{'self_mha': mha_params(), 'cross_mha': mha_params(),
                        'ffn': ffn_params()}
                       for _ in range(cfg['de_n_layers'])],
    }
    return params


# ----------------------------------------------------------------------------
# Main
# ----------------------------------------------------------------------------

if __name__ == "__main__":
    # Lane-dense config: d_model, H*d_k, H*d_v, vocab are multiples of 128.
    cfg = dict(src_vocab=128, tgt_vocab=128, d_model=128, d_k=32, d_v=32,
               d_ff=256, n_heads=4, en_n_layers=2, de_n_layers=2, max_len=64)

    key = jax.random.PRNGKey(0)
    k_param, k_src, k_tgt = jax.random.split(key, 3)
    params = init_params(k_param, cfg)

    B, L = 2, 8
    enc_inputs = jax.random.randint(k_src, (B, L), 1, cfg['src_vocab'], dtype=jnp.int32)
    dec_inputs = jax.random.randint(k_tgt, (B, L), 1, cfg['tgt_vocab'], dtype=jnp.int32)

    fwd = jax.jit(lambda ei, di, p: transformer_forward(ei, di, p, cfg))
    logits, enc_attns, dec_self_attns, dec_enc_attns = fwd(enc_inputs, dec_inputs, params)

    jax.block_until_ready(logits)
    for a in enc_attns + dec_self_attns + dec_enc_attns:
        jax.block_until_ready(a)

    assert logits.shape == (B * L, cfg['tgt_vocab'])
    assert enc_attns[0].shape == (B, cfg['n_heads'], L, L)
    assert jnp.all(jnp.isfinite(logits))
    assert jnp.all(jnp.isfinite(enc_attns[0]))
    print("KERNEL_OK")
</pallas_src>

<mosaic_0001>
module attributes {stable_mosaic.version = 11 : i64} {
  func.func @_mha_block_kernel(%arg0: i32, %arg1: memref<1x8x128xf32, #tpu.memory_space<vmem>>, %arg2: memref<1x8x128xf32, #tpu.memory_space<vmem>>, %arg3: memref<1x8x8xbf16, #tpu.memory_space<vmem>>, %arg4: memref<128x128xbf16, #tpu.memory_space<vmem>>, %arg5: memref<128x256xbf16, #tpu.memory_space<vmem>>, %arg6: memref<128x128xbf16, #tpu.memory_space<vmem>>, %arg7: memref<1x128xf32, #tpu.memory_space<vmem>>, %arg8: memref<1x128xf32, #tpu.memory_space<vmem>>, %arg9: memref<1x8x128xf32, #tpu.memory_space<vmem>>, %arg10: memref<1x4x8x8xf32, #tpu.memory_space<vmem>>) attributes {dimension_semantics = [#tpu.dimension_semantics<parallel>], iteration_bounds = array<i64: 2>, scalar_prefetch = 0 : i64, scratch_operands = 0 : i64, tpu.core_type = #tpu.core_type<tc>, window_params = [{transform_indices = @transform_0, window_bounds = array<i64: 1, 8, 128>}, {transform_indices = @transform_1, window_bounds = array<i64: 1, 8, 128>}, {transform_indices = @transform_2, window_bounds = array<i64: 1, 8, 8>}, {pipeline_mode = #tpu.pipeline_mode<synchronous>, transform_indices = @transform_3, window_bounds = array<i64: 128, 128>}, {pipeline_mode = #tpu.pipeline_mode<synchronous>, transform_indices = @transform_4, window_bounds = array<i64: 128, 256>}, {pipeline_mode = #tpu.pipeline_mode<synchronous>, transform_indices = @transform_5, window_bounds = array<i64: 128, 128>}, {pipeline_mode = #tpu.pipeline_mode<synchronous>, transform_indices = @transform_6, window_bounds = array<i64: 1, 128>}, {pipeline_mode = #tpu.pipeline_mode<synchronous>, transform_indices = @transform_7, window_bounds = array<i64: 1, 128>}, {transform_indices = @transform_8, window_bounds = array<i64: 1, 8, 128>}, {transform_indices = @transform_9, window_bounds = array<i64: 1, 4, 8, 8>}]} {
    %c0 = arith.constant 0 : index
    %c0_0 = arith.constant 0 : index
    %c0_1 = arith.constant 0 : index
    %0 = vector.load %arg1[%c0, %c0_0, %c0_1] : memref<1x8x128xf32, #tpu.memory_space<vmem>>, vector<1x8x128xf32>
    %1 = vector.shape_cast %0 : vector<1x8x128xf32> to vector<8x128xf32>
    %2 = arith.truncf %1 : vector<8x128xf32> to vector<8x128xbf16>
    %c0_2 = arith.constant 0 : index
    %c0_3 = arith.constant 0 : index
    %c0_4 = arith.constant 0 : index
    %3 = vector.load %arg2[%c0_2, %c0_3, %c0_4] : memref<1x8x128xf32, #tpu.memory_space<vmem>>, vector<1x8x128xf32>
    %4 = vector.shape_cast %3 : vector<1x8x128xf32> to vector<8x128xf32>
    %5 = arith.truncf %4 : vector<8x128xf32> to vector<8x128xbf16>
    %c0_5 = arith.constant 0 : index
    %c0_6 = arith.constant 0 : index
    %6 = vector.load %arg4[%c0_5, %c0_6] : memref<128x128xbf16, #tpu.memory_space<vmem>>, vector<128x128xbf16>
    %cst = arith.constant dense<0.000000e+00> : vector<8x128xf32>
    %7 = tpu.matmul %2, %6, %cst {dimension_numbers = #tpu.dot_dimension_numbers<[1], [0], [0], [1], [0, 0, 1, 1], [], []>} : vector<8x128xbf16>, vector<128x128xbf16>, vector<8x128xf32> -> vector<8x128xf32>
    %8 = arith.truncf %7 : vector<8x128xf32> to vector<8x128xbf16>
    %c0_7 = arith.constant 0 : index
    %c0_8 = arith.constant 0 : index
    %9 = vector.load %arg5[%c0_7, %c0_8] : memref<128x256xbf16, #tpu.memory_space<vmem>>, vector<128x256xbf16>
    %cst_9 = arith.constant dense<0.000000e+00> : vector<8x256xf32>
    %10 = tpu.matmul %5, %9, %cst_9 {dimension_numbers = #tpu.dot_dimension_numbers<[1], [0], [0], [1], [0, 0, 1, 1], [], []>} : vector<8x128xbf16>, vector<128x256xbf16>, vector<8x256xf32> -> vector<8x256xf32>
    %11 = vector.extract_strided_slice %10 {offsets = [0, 0], sizes = [8, 128], strides = [1, 1]} : vector<8x256xf32> to vector<8x128xf32>
    %12 = arith.truncf %11 : vector<8x128xf32> to vector<8x128xbf16>
    %13 = vector.extract_strided_slice %10 {offsets = [0, 128], sizes = [8, 128], strides = [1, 1]} : vector<8x256xf32> to vector<8x128xf32>
    %14 = arith.truncf %13 : vector<8x128xf32> to vector<8x128xbf16>
    %c0_10 = arith.constant 0 : index
    %c0_11 = arith.constant 0 : index
    %c0_12 = arith.constant 0 : index
    %15 = vector.load %arg3[%c0_10, %c0_11, %c0_12] : memref<1x8x8xbf16, #tpu.memory_space<vmem>>, vector<1x8x8xbf16>
    %16 = vector.shape_cast %15 : vector<1x8x8xbf16> to vector<8x8xbf16>
    %17 = arith.extf %16 : vector<8x8xbf16> to vector<8x8xf32>
    %18 = vector.extract_strided_slice %8 {offsets = [0, 0], sizes = [8, 32], strides = [1, 1]} : vector<8x128xbf16> to vector<8x32xbf16>
    %19 = vector.extract_strided_slice %12 {offsets = [0, 0], sizes = [8, 32], strides = [1, 1]} : vector<8x128xbf16> to vector<8x32xbf16>
    %20 = vector.extract_strided_slice %14 {offsets = [0, 0], sizes = [8, 32], strides = [1, 1]} : vector<8x128xbf16> to vector<8x32xbf16>
    %cst_13 = arith.constant dense<0.000000e+00> : vector<8x8xf32>
    %21 = tpu.matmul %18, %19, %cst_13 {dimension_numbers = #tpu.dot_dimension_numbers<[1], [1], [0], [0], [0, 0, 1, 0], [], []>} : vector<8x32xbf16>, vector<8x32xbf16>, vector<8x8xf32> -> vector<8x8xf32>
    %22 = arith.addf %21, %17 : vector<8x8xf32>
    %cst_14 = arith.constant dense<0xFF800000> : vector<8xf32>
    %23 = vector.multi_reduction <maximumf>, %22, %cst_14 [1] : vector<8x8xf32> to vector<8xf32>
    %24 = vector.shape_cast %23 : vector<8xf32> to vector<8x1xf32>
    %25 = vector.broadcast %24 : vector<8x1xf32> to vector<8x8xf32>
    %26 = arith.subf %22, %25 : vector<8x8xf32>
    %27 = math.exp %26 : vector<8x8xf32>
    %cst_15 = arith.constant dense<0.000000e+00> : vector<8xf32>
    %28 = vector.multi_reduction <add>, %27, %cst_15 [1] : vector<8x8xf32> to vector<8xf32>
    %29 = vector.shape_cast %28 : vector<8xf32> to vector<8x1xf32>
    %30 = tpu.reciprocal %29 {approx = true} : vector<8x1xf32> -> vector<8x1xf32>
    %31 = vector.broadcast %30 : vector<8x1xf32> to vector<8x8xf32>
    %32 = arith.mulf %27, %31 : vector<8x8xf32>
    %c0_16 = arith.constant 0 : index
    %c0_17 = arith.constant 0 : index
    %c0_18 = arith.constant 0 : index
    %c0_19 = arith.constant 0 : index
    %33 = vector.load %arg10[%c0_16, %c0_17, %c0_18, %c0_19] : memref<1x4x8x8xf32, #tpu.memory_space<vmem>>, vector<1x1x8x8xf32>
    %34 = vector.shape_cast %33 : vector<1x1x8x8xf32> to vector<8x8xf32>
    %35 = vector.shape_cast %32 : vector<8x8xf32> to vector<1x1x8x8xf32>
    tpu.vector_store %arg10[%c0_16, %c0_17, %c0_18, %c0_19], %35 {strides = array<i32>} : memref<1x4x8x8xf32, #tpu.memory_space<vmem>>, vector<1x1x8x8xf32>,
    %36 = arith.truncf %32 : vector<8x8xf32> to vector<8x8xbf16>
    %cst_20 = arith.constant dense<0.000000e+00> : vector<8x32xf32>
    %37 = tpu.matmul %36, %20, %cst_20 {dimension_numbers = #tpu.dot_dimension_numbers<[1], [0], [0], [1], [0, 0, 1, 1], [], []>} : vector<8x8xbf16>, vector<8x32xbf16>, vector<8x32xf32> -> vector<8x32xf32>
    %38 = vector.extract_strided_slice %8 {offsets = [0, 32], sizes = [8, 32], strides = [1, 1]} : vector<8x128xbf16> to vector<8x32xbf16>
    %39 = vector.extract_strided_slice %12 {offsets = [0, 32], sizes = [8, 32], strides = [1, 1]} : vector<8x128xbf16> to vector<8x32xbf16>
    %40 = vector.extract_strided_slice %14 {offsets = [0, 32], sizes = [8, 32], strides = [1, 1]} : vector<8x128xbf16> to vector<8x32xbf16>
    %cst_21 = arith.constant dense<0.000000e+00> : vector<8x8xf32>
    %41 = tpu.matmul %38, %39, %cst_21 {dimension_numbers = #tpu.dot_dimension_numbers<[1], [1], [0], [0], [0, 0, 1, 0], [], []>} : vector<8x32xbf16>, vector<8x32xbf16>, vector<8x8xf32> -> vector<8x8xf32>
    %42 = arith.addf %41, %17 : vector<8x8xf32>
    %cst_22 = arith.constant dense<0xFF800000> : vector<8xf32>
    %43 = vector.multi_reduction <maximumf>, %42, %cst_22 [1] : vector<8x8xf32> to vector<8xf32>
    %44 = vector.shape_cast %43 : vector<8xf32> to vector<8x1xf32>
    %45 = vector.broadcast %44 : vector<8x1xf32> to vector<8x8xf32>
    %46 = arith.subf %42, %45 : vector<8x8xf32>
    %47 = math.exp %46 : vector<8x8xf32>
    %cst_23 = arith.constant dense<0.000000e+00> : vector<8xf32>
    %48 = vector.multi_reduction <add>, %47, %cst_23 [1] : vector<8x8xf32> to vector<8xf32>
    %49 = vector.shape_cast %48 : vector<8xf32> to vector<8x1xf32>
    %50 = tpu.reciprocal %49 {approx = true} : vector<8x1xf32> -> vector<8x1xf32>
    %51 = vector.broadcast %50 : vector<8x1xf32> to vector<8x8xf32>
    %52 = arith.mulf %47, %51 : vector<8x8xf32>
    %c0_24 = arith.constant 0 : index
    %c1 = arith.constant 1 : index
    %c0_25 = arith.constant 0 : index
    %c0_26 = arith.constant 0 : index
    %53 = vector.load %arg10[%c0_24, %c1, %c0_25, %c0_26] : memref<1x4x8x8xf32, #tpu.memory_space<vmem>>, vector<1x1x8x8xf32>
    %54 = vector.shape_cast %53 : vector<1x1x8x8xf32> to vector<8x8xf32>
    %55 = vector.shape_cast %52 : vector<8x8xf32> to vector<1x1x8x8xf32>
    tpu.vector_store %arg10[%c0_24, %c1, %c0_25, %c0_26], %55 {strides = array<i32>} : memref<1x4x8x8xf32, #tpu.memory_space<vmem>>, vector<1x1x8x8xf32>,
    %56 = arith.truncf %52 : vector<8x8xf32> to vector<8x8xbf16>
    %cst_27 = arith.constant dense<0.000000e+00> : vector<8x32xf32>
    %57 = tpu.matmul %56, %40, %cst_27 {dimension_numbers = #tpu.dot_dimension_numbers<[1], [0], [0], [1], [0, 0, 1, 1], [], []>} : vector<8x8xbf16>, vector<8x32xbf16>, vector<8x32xf32> -> vector<8x32xf32>
    %58 = vector.extract_strided_slice %8 {offsets = [0, 64], sizes = [8, 32], strides = [1, 1]} : vector<8x128xbf16> to vector<8x32xbf16>
    %59 = vector.extract_strided_slice %12 {offsets = [0, 64], sizes = [8, 32], strides = [1, 1]} : vector<8x128xbf16> to vector<8x32xbf16>
    %60 = vector.extract_strided_slice %14 {offsets = [0, 64], sizes = [8, 32], strides = [1, 1]} : vector<8x128xbf16> to vector<8x32xbf16>
    %cst_28 = arith.constant dense<0.000000e+00> : vector<8x8xf32>
    %61 = tpu.matmul %58, %59, %cst_28 {dimension_numbers = #tpu.dot_dimension_numbers<[1], [1], [0], [0], [0, 0, 1, 0], [], []>} : vector<8x32xbf16>, vector<8x32xbf16>, vector<8x8xf32> -> vector<8x8xf32>
    %62 = arith.addf %61, %17 : vector<8x8xf32>
    %cst_29 = arith.constant dense<0xFF800000> : vector<8xf32>
    %63 = vector.multi_reduction <maximumf>, %62, %cst_29 [1] : vector<8x8xf32> to vector<8xf32>
    %64 = vector.shape_cast %63 : vector<8xf32> to vector<8x1xf32>
    %65 = vector.broadcast %64 : vector<8x1xf32> to vector<8x8xf32>
    %66 = arith.subf %62, %65 : vector<8x8xf32>
    %67 = math.exp %66 : vector<8x8xf32>
    %cst_30 = arith.constant dense<0.000000e+00> : vector<8xf32>
    %68 = vector.multi_reduction <add>, %67, %cst_30 [1] : vector<8x8xf32> to vector<8xf32>
    %69 = vector.shape_cast %68 : vector<8xf32> to vector<8x1xf32>
    %70 = tpu.reciprocal %69 {approx = true} : vector<8x1xf32> -> vector<8x1xf32>
    %71 = vector.broadcast %70 : vector<8x1xf32> to vector<8x8xf32>
    %72 = arith.mulf %67, %71 : vector<8x8xf32>
    %c0_31 = arith.constant 0 : index
    %c2 = arith.constant 2 : index
    %c0_32 = arith.constant 0 : index
    %c0_33 = arith.constant 0 : index
    %73 = vector.load %arg10[%c0_31, %c2, %c0_32, %c0_33] : memref<1x4x8x8xf32, #tpu.memory_space<vmem>>, vector<1x1x8x8xf32>
    %74 = vector.shape_cast %73 : vector<1x1x8x8xf32> to vector<8x8xf32>
    %75 = vector.shape_cast %72 : vector<8x8xf32> to vector<1x1x8x8xf32>
    tpu.vector_store %arg10[%c0_31, %c2, %c0_32, %c0_33], %75 {strides = array<i32>} : memref<1x4x8x8xf32, #tpu.memory_space<vmem>>, vector<1x1x8x8xf32>,
    %76 = arith.truncf %72 : vector<8x8xf32> to vector<8x8xbf16>
    %cst_34 = arith.constant dense<0.000000e+00> : vector<8x32xf32>
    %77 = tpu.matmul %76, %60, %cst_34 {dimension_numbers = #tpu.dot_dimension_numbers<[1], [0], [0], [1], [0, 0, 1, 1], [], []>} : vector<8x8xbf16>, vector<8x32xbf16>, vector<8x32xf32> -> vector<8x32xf32>
    %78 = vector.extract_strided_slice %8 {offsets = [0, 96], sizes = [8, 32], strides = [1, 1]} : vector<8x128xbf16> to vector<8x32xbf16>
    %79 = vector.extract_strided_slice %12 {offsets = [0, 96], sizes = [8, 32], strides = [1, 1]} : vector<8x128xbf16> to vector<8x32xbf16>
    %80 = vector.extract_strided_slice %14 {offsets = [0, 96], sizes = [8, 32], strides = [1, 1]} : vector<8x128xbf16> to vector<8x32xbf16>
    %cst_35 = arith.constant dense<0.000000e+00> : vector<8x8xf32>
    %81 = tpu.matmul %78, %79, %cst_35 {dimension_numbers = #tpu.dot_dimension_numbers<[1], [1], [0], [0], [0, 0, 1, 0], [], []>} : vector<8x32xbf16>, vector<8x32xbf16>, vector<8x8xf32> -> vector<8x8xf32>
    %82 = arith.addf %81, %17 : vector<8x8xf32>
    %cst_36 = arith.constant dense<0xFF800000> : vector<8xf32>
    %83 = vector.multi_reduction <maximumf>, %82, %cst_36 [1] : vector<8x8xf32> to vector<8xf32>
    %84 = vector.shape_cast %83 : vector<8xf32> to vector<8x1xf32>
    %85 = vector.broadcast %84 : vector<8x1xf32> to vector<8x8xf32>
    %86 = arith.subf %82, %85 : vector<8x8xf32>
    %87 = math.exp %86 : vector<8x8xf32>
    %cst_37 = arith.constant dense<0.000000e+00> : vector<8xf32>
    %88 = vector.multi_reduction <add>, %87, %cst_37 [1] : vector<8x8xf32> to vector<8xf32>
    %89 = vector.shape_cast %88 : vector<8xf32> to vector<8x1xf32>
    %90 = tpu.reciprocal %89 {approx = true} : vector<8x1xf32> -> vector<8x1xf32>
    %91 = vector.broadcast %90 : vector<8x1xf32> to vector<8x8xf32>
    %92 = arith.mulf %87, %91 : vector<8x8xf32>
    %c0_38 = arith.constant 0 : index
    %c3 = arith.constant 3 : index
    %c0_39 = arith.constant 0 : index
    %c0_40 = arith.constant 0 : index
    %93 = vector.load %arg10[%c0_38, %c3, %c0_39, %c0_40] : memref<1x4x8x8xf32, #tpu.memory_space<vmem>>, vector<1x1x8x8xf32>
    %94 = vector.shape_cast %93 : vector<1x1x8x8xf32> to vector<8x8xf32>
    %95 = vector.shape_cast %92 : vector<8x8xf32> to vector<1x1x8x8xf32>
    tpu.vector_store %arg10[%c0_38, %c3, %c0_39, %c0_40], %95 {strides = array<i32>} : memref<1x4x8x8xf32, #tpu.memory_space<vmem>>, vector<1x1x8x8xf32>,
    %96 = arith.truncf %92 : vector<8x8xf32> to vector<8x8xbf16>
    %cst_41 = arith.constant dense<0.000000e+00> : vector<8x32xf32>
    %97 = tpu.matmul %96, %80, %cst_41 {dimension_numbers = #tpu.dot_dimension_numbers<[1], [0], [0], [1], [0, 0, 1, 1], [], []>} : vector<8x8xbf16>, vector<8x32xbf16>, vector<8x32xf32> -> vector<8x32xf32>
    %98 = tpu.concatenate %37, %57, %77, %97 in 1 : vector<8x32xf32>, vector<8x32xf32>, vector<8x32xf32>, vector<8x32xf32> -> vector<8x128xf32>
    %99 = arith.truncf %98 : vector<8x128xf32> to vector<8x128xbf16>
    %c0_42 = arith.constant 0 : index
    %c0_43 = arith.constant 0 : index
    %100 = vector.load %arg6[%c0_42, %c0_43] : memref<128x128xbf16, #tpu.memory_space<vmem>>, vector<128x128xbf16>
    %cst_44 = arith.constant dense<0.000000e+00> : vector<8x128xf32>
    %101 = tpu.matmul %99, %100, %cst_44 {dimension_numbers = #tpu.dot_dimension_numbers<[1], [0], [0], [1], [0, 0, 1, 1], [], []>} : vector<8x128xbf16>, vector<128x128xbf16>, vector<8x128xf32> -> vector<8x128xf32>
    %102 = arith.addf %101, %1 : vector<8x128xf32>
    %cst_45 = arith.constant dense<0.000000e+00> : vector<8xf32>
    %103 = vector.multi_reduction <add>, %102, %cst_45 [1] : vector<8x128xf32> to vector<8xf32>
    %104 = vector.shape_cast %103 : vector<8xf32> to vector<8x1xf32>
    %cst_46 = arith.constant 1.280000e+02 : f32
    %105 = vector.broadcast %cst_46 : f32 to vector<8x1xf32>
    %106 = arith.divf %104, %105 : vector<8x1xf32>
    %107 = vector.broadcast %106 : vector<8x1xf32> to vector<8x128xf32>
    %108 = arith.subf %102, %107 : vector<8x128xf32>
    %109 = arith.mulf %108, %108 : vector<8x128xf32>
    %cst_47 = arith.constant dense<0.000000e+00> : vector<8xf32>
    %110 = vector.multi_reduction <add>, %109, %cst_47 [1] : vector<8x128xf32> to vector<8xf32>
    %111 = vector.shape_cast %110 : vector<8xf32> to vector<8x1xf32>
    %cst_48 = arith.constant 1.280000e+02 : f32
    %112 = vector.broadcast %cst_48 : f32 to vector<8x1xf32>
    %113 = arith.divf %111, %112 : vector<8x1xf32>
    %114 = vector.broadcast %106 : vector<8x1xf32> to vector<8x128xf32>
    %115 = arith.subf %102, %114 : vector<8x128xf32>
    %cst_49 = arith.constant 9.99999974E-6 : f32
    %116 = vector.broadcast %cst_49 : f32 to vector<8x1xf32>
    %117 = arith.addf %113, %116 : vector<8x1xf32>
    %118 = math.rsqrt %117 : vector<8x1xf32>
    %119 = vector.broadcast %118 : vector<8x1xf32> to vector<8x128xf32>
    %120 = arith.mulf %115, %119 : vector<8x128xf32>
    %c0_50 = arith.constant 0 : index
    %c0_51 = arith.constant 0 : index
    %121 = vector.load %arg7[%c0_50, %c0_51] : memref<1x128xf32, #tpu.memory_space<vmem>>, vector<1x128xf32>
    %122 = vector.broadcast %121 : vector<1x128xf32> to vector<8x128xf32>
    %123 = arith.mulf %120, %122 : vector<8x128xf32>
    %c0_52 = arith.constant 0 : index
    %c0_53 = arith.constant 0 : index
    %124 = vector.load %arg8[%c0_52, %c0_53] : memref<1x128xf32, #tpu.memory_space<vmem>>, vector<1x128xf32>
    %125 = vector.broadcast %124 : vector<1x128xf32> to vector<8x128xf32>
    %126 = arith.addf %123, %125 : vector<8x128xf32>
    %c0_54 = arith.constant 0 : index
    %c0_55 = arith.constant 0 : index
    %c0_56 = arith.constant 0 : index
    %127 = vector.load %arg9[%c0_54, %c0_55, %c0_56] : memref<1x8x128xf32, #tpu.memory_space<vmem>>, vector<1x8x128xf32>
    %128 = vector.shape_cast %127 : vector<1x8x128xf32> to vector<8x128xf32>
    %129 = vector.shape_cast %126 : vector<8x128xf32> to vector<1x8x128xf32>
    tpu.vector_store %arg9[%c0_54, %c0_55, %c0_56], %129 {strides = array<i32>} : memref<1x8x128xf32, #tpu.memory_space<vmem>>, vector<1x8x128xf32>,
    return
  }
  func.func @transform_0(%arg0: i32) -> (i32, i32, i32) {
    %c0_i32 = arith.constant 0 : i32
    %c0_i32_0 = arith.constant 0 : i32
    %c0_i32_1 = arith.constant 0 : i32
    return %arg0, %c0_i32, %c0_i32_0 : i32, i32, i32
  }
  func.func @transform_1(%arg0: i32) -> (i32, i32, i32) {
    %c0_i32 = arith.constant 0 : i32
    %c0_i32_0 = arith.constant 0 : i32
    %c0_i32_1 = arith.constant 0 : i32
    return %arg0, %c0_i32, %c0_i32_0 : i32, i32, i32
  }
  func.func @transform_2(%arg0: i32) -> (i32, i32, i32) {
    %c0_i32 = arith.constant 0 : i32
    %c0_i32_0 = arith.constant 0 : i32
    %c0_i32_1 = arith.constant 0 : i32
    return %arg0, %c0_i32, %c0_i32_0 : i32, i32, i32
  }
  func.func @transform_3(%arg0: i32) -> (i32, i32) {
    %c0_i32 = arith.constant 0 : i32
    %c0_i32_0 = arith.constant 0 : i32
    %c0_i32_1 = arith.constant 0 : i32
    return %c0_i32, %c0_i32_0 : i32, i32
  }
  func.func @transform_4(%arg0: i32) -> (i32, i32) {
    %c0_i32 = arith.constant 0 : i32
    %c0_i32_0 = arith.constant 0 : i32
    %c0_i32_1 = arith.constant 0 : i32
    return %c0_i32, %c0_i32_0 : i32, i32
  }
  func.func @transform_5(%arg0: i32) -> (i32, i32) {
    %c0_i32 = arith.constant 0 : i32
    %c0_i32_0 = arith.constant 0 : i32
    %c0_i32_1 = arith.constant 0 : i32
    return %c0_i32, %c0_i32_0 : i32, i32
  }
  func.func @transform_6(%arg0: i32) -> (i32, i32) {
    %c0_i32 = arith.constant 0 : i32
    %c0_i32_0 = arith.constant 0 : i32
    %c0_i32_1 = arith.constant 0 : i32
    return %c0_i32, %c0_i32_0 : i32, i32
  }
  func.func @transform_7(%arg0: i32) -> (i32, i32) {
    %c0_i32 = arith.constant 0 : i32
    %c0_i32_0 = arith.constant 0 : i32
    %c0_i32_1 = arith.constant 0 : i32
    return %c0_i32, %c0_i32_0 : i32, i32
  }
  func.func @transform_8(%arg0: i32) -> (i32, i32, i32) {
    %c0_i32 = arith.constant 0 : i32
    %c0_i32_0 = arith.constant 0 : i32
    %c0_i32_1 = arith.constant 0 : i32
    return %arg0, %c0_i32, %c0_i32_0 : i32, i32, i32
  }
  func.func @transform_9(%arg0: i32) -> (i32, i32, i32, i32) {
    %c0_i32 = arith.constant 0 : i32
    %c0_i32_0 = arith.constant 0 : i32
    %c0_i32_1 = arith.constant 0 : i32
    %c0_i32_2 = arith.constant 0 : i32
    return %arg0, %c0_i32, %c0_i32_0, %c0_i32_1 : i32, i32, i32, i32
  }
}

module attributes {stable_mosaic.version = 11 : i64} {
  func.func @_ffn_res_ln_kernel(%arg0: i32, %arg1: i32, %arg2: memref<16x128xbf16, #tpu.memory_space<vmem>>, %arg3: memref<128x256xbf16, #tpu.memory_space<vmem>>, %arg4: memref<256x128xbf16, #tpu.memory_space<vmem>>, %arg5: memref<16x128xf32, #tpu.memory_space<vmem>>, %arg6: memref<1x128xf32, #tpu.memory_space<vmem>>, %arg7: memref<1x128xf32, #tpu.memory_space<vmem>>, %arg8: memref<16x128xf32, #tpu.memory_space<vmem>>, %arg9: memref<16x128xf32, #tpu.memory_space<vmem>>) attributes {dimension_semantics = [#tpu.dimension_semantics<parallel>, #tpu.dimension_semantics<arbitrary>], iteration_bounds = array<i64: 1, 1>, scalar_prefetch = 0 : i64, scratch_operands = 1 : i64, tpu.core_type = #tpu.core_type<tc>, window_params = [{transform_indices = @transform_0, window_bounds = array<i64: 16, 128>}, {transform_indices = @transform_1, window_bounds = array<i64: 128, 256>}, {transform_indices = @transform_2, window_bounds = array<i64: 256, 128>}, {transform_indices = @transform_3, window_bounds = array<i64: 16, 128>}, {pipeline_mode = #tpu.pipeline_mode<synchronous>, transform_indices = @transform_4, window_bounds = array<i64: 1, 128>}, {pipeline_mode = #tpu.pipeline_mode<synchronous>, transform_indices = @transform_5, window_bounds = array<i64: 1, 128>}, {transform_indices = @transform_6, window_bounds = array<i64: 16, 128>}]} {
    %c0_i32 = arith.constant 0 : i32
    %0 = arith.cmpi eq, %arg1, %c0_i32 : i32
    %1 = arith.extui %0 : i1 to i32
    %c0_i32_0 = arith.constant 0 : i32
    %2 = arith.cmpi ne, %1, %c0_i32_0 : i32
    scf.if %2 {
      %cst_14 = arith.constant 0.000000e+00 : f32
      %17 = vector.broadcast %cst_14 : f32 to vector<16x128xf32>
      %c0_15 = arith.constant 0 : index
      %c0_16 = arith.constant 0 : index
      %18 = vector.load %arg9[%c0_15, %c0_16] : memref<16x128xf32, #tpu.memory_space<vmem>>, vector<16x128xf32>
      tpu.vector_store %arg9[%c0_15, %c0_16], %17 {strides = array<i32>} : memref<16x128xf32, #tpu.memory_space<vmem>>, vector<16x128xf32>,
    } else {
    }
    %c0 = arith.constant 0 : index
    %c0_1 = arith.constant 0 : index
    %3 = vector.load %arg2[%c0, %c0_1] : memref<16x128xbf16, #tpu.memory_space<vmem>>, vector<16x128xbf16>
    %c0_2 = arith.constant 0 : index
    %c0_3 = arith.constant 0 : index
    %4 = vector.load %arg3[%c0_2, %c0_3] : memref<128x256xbf16, #tpu.memory_space<vmem>>, vector<128x256xbf16>
    %cst = arith.constant dense<0.000000e+00> : vector<16x256xf32>
    %5 = tpu.matmul %3, %4, %cst {dimension_numbers = #tpu.dot_dimension_numbers<[1], [0], [0], [1], [0, 0, 1, 1], [], []>} : vector<16x128xbf16>, vector<128x256xbf16>, vector<16x256xf32> -> vector<16x256xf32>
    %cst_4 = arith.constant 0.000000e+00 : f32
    %6 = vector.broadcast %cst_4 : f32 to vector<16x256xf32>
    %7 = arith.maximumf %5, %6 : vector<16x256xf32>
    %8 = arith.truncf %7 : vector<16x256xf32> to vector<16x256xbf16>
    %c0_5 = arith.constant 0 : index
    %c0_6 = arith.constant 0 : index
    %9 = vector.load %arg9[%c0_5, %c0_6] : memref<16x128xf32, #tpu.memory_space<vmem>>, vector<16x128xf32>
    %c0_7 = arith.constant 0 : index
    %c0_8 = arith.constant 0 : index
    %10 = vector.load %arg4[%c0_7, %c0_8] : memref<256x128xbf16, #tpu.memory_space<vmem>>, vector<256x128xbf16>
    %cst_9 = arith.constant dense<0.000000e+00> : vector<16x128xf32>
    %11 = tpu.matmul %8, %10, %cst_9 {dimension_numbers = #tpu.dot_dimension_numbers<[1], [0], [0], [1], [0, 0, 1, 1], [], []>} : vector<16x256xbf16>, vector<256x128xbf16>, vector<16x128xf32> -> vector<16x128xf32>
    %12 = arith.addf %9, %11 : vector<16x128xf32>
    %c0_10 = arith.constant 0 : index
    %c0_11 = arith.constant 0 : index
    %13 = vector.load %arg9[%c0_10, %c0_11] : memref<16x128xf32, #tpu.memory_space<vmem>>, vector<16x128xf32>
    tpu.vector_store %arg9[%c0_10, %c0_11], %12 {strides = array<i32>} : memref<16x128xf32, #tpu.memory_space<vmem>>, vector<16x128xf32>,
    %c0_i32_12 = arith.constant 0 : i32
    %14 = arith.cmpi eq, %arg1, %c0_i32_12 : i32
    %15 = arith.extui %14 : i1 to i32
    %c0_i32_13 = arith.constant 0 : i32
    %16 = arith.cmpi ne, %15, %c0_i32_13 : i32
    scf.if %16 {
      %c0_14 = arith.constant 0 : index
      %c0_15 = arith.constant 0 : index
      %17 = vector.load %arg9[%c0_14, %c0_15] : memref<16x128xf32, #tpu.memory_space<vmem>>, vector<16x128xf32>
      %c0_16 = arith.constant 0 : index
      %c0_17 = arith.constant 0 : index
      %18 = vector.load %arg5[%c0_16, %c0_17] : memref<16x128xf32, #tpu.memory_space<vmem>>, vector<16x128xf32>
      %19 = arith.addf %17, %18 : vector<16x128xf32>
      %cst_18 = arith.constant dense<0.000000e+00> : vector<16xf32>
      %20 = vector.multi_reduction <add>, %19, %cst_18 [1] : vector<16x128xf32> to vector<16xf32>
      %21 = vector.shape_cast %20 : vector<16xf32> to vector<16x1xf32>
      %cst_19 = arith.constant 1.280000e+02 : f32
      %22 = vector.broadcast %cst_19 : f32 to vector<16x1xf32>
      %23 = arith.divf %21, %22 : vector<16x1xf32>
      %24 = vector.broadcast %23 : vector<16x1xf32> to vector<16x128xf32>
      %25 = arith.subf %19, %24 : vector<16x128xf32>
      %26 = arith.mulf %25, %25 : vector<16x128xf32>
      %cst_20 = arith.constant dense<0.000000e+00> : vector<16xf32>
      %27 = vector.multi_reduction <add>, %26, %cst_20 [1] : vector<16x128xf32> to vector<16xf32>
      %28 = vector.shape_cast %27 : vector<16xf32> to vector<16x1xf32>
      %cst_21 = arith.constant 1.280000e+02 : f32
      %29 = vector.broadcast %cst_21 : f32 to vector<16x1xf32>
      %30 = arith.divf %28, %29 : vector<16x1xf32>
      %31 = vector.broadcast %23 : vector<16x1xf32> to vector<16x128xf32>
      %32 = arith.subf %19, %31 : vector<16x128xf32>
      %cst_22 = arith.constant 9.99999974E-6 : f32
      %33 = vector.broadcast %cst_22 : f32 to vector<16x1xf32>
      %34 = arith.addf %30, %33 : vector<16x1xf32>
      %35 = math.rsqrt %34 : vector<16x1xf32>
      %36 = vector.broadcast %35 : vector<16x1xf32> to vector<16x128xf32>
      %37 = arith.mulf %32, %36 : vector<16x128xf32>
      %c0_23 = arith.constant 0 : index
      %c0_24 = arith.constant 0 : index
      %38 = vector.load %arg6[%c0_23, %c0_24] : memref<1x128xf32, #tpu.memory_space<vmem>>, vector<1x128xf32>
      %39 = vector.broadcast %38 : vector<1x128xf32> to vector<16x128xf32>
      %40 = arith.mulf %37, %39 : vector<16x128xf32>
      %c0_25 = arith.constant 0 : index
      %c0_26 = arith.constant 0 : index
      %41 = vector.load %arg7[%c0_25, %c0_26] : memref<1x128xf32, #tpu.memory_space<vmem>>, vector<1x128xf32>
      %42 = vector.broadcast %41 : vector<1x128xf32> to vector<16x128xf32>
      %43 = arith.addf %40, %42 : vector<16x128xf32>
      %c0_27 = arith.constant 0 : index
      %c0_28 = arith.constant 0 : index
      %44 = vector.load %arg8[%c0_27, %c0_28] : memref<16x128xf32, #tpu.memory_space<vmem>>, vector<16x128xf32>
      tpu.vector_store %arg8[%c0_27, %c0_28], %43 {strides = array<i32>} : memref<16x128xf32, #tpu.memory_space<vmem>>, vector<16x128xf32>,
    } else {
    }
    return
  }
  func.func @transform_0(%arg0: i32, %arg1: i32) -> (i32, i32) {
    %c0_i32 = arith.constant 0 : i32
    %c0_i32_0 = arith.constant 0 : i32
    return %arg0, %c0_i32 : i32, i32
  }
  func.func @transform_1(%arg0: i32, %arg1: i32) -> (i32, i32) {
    %c0_i32 = arith.constant 0 : i32
    %c0_i32_0 = arith.constant 0 : i32
    return %c0_i32, %arg1 : i32, i32
  }
  func.func @transform_2(%arg0: i32, %arg1: i32) -> (i32, i32) {
    %c0_i32 = arith.constant 0 : i32
    %c0_i32_0 = arith.constant 0 : i32
    return %arg1, %c0_i32 : i32, i32
  }
  func.func @transform_3(%arg0: i32, %arg1: i32) -> (i32, i32) {
    %c0_i32 = arith.constant 0 : i32
    %c0_i32_0 = arith.constant 0 : i32
    return %arg0, %c0_i32 : i32, i32
  }
  func.func @transform_4(%arg0: i32, %arg1: i32) -> (i32, i32) {
    %c0_i32 = arith.constant 0 : i32
    %c0_i32_0 = arith.constant 0 : i32
    %c0_i32_1 = arith.constant 0 : i32
    return %c0_i32, %c0_i32_0 : i32, i32
  }
  func.func @transform_5(%arg0: i32, %arg1: i32) -> (i32, i32) {
    %c0_i32 = arith.constant 0 : i32
    %c0_i32_0 = arith.constant 0 : i32
    %c0_i32_1 = arith.constant 0 : i32
    return %c0_i32, %c0_i32_0 : i32, i32
  }
  func.func @transform_6(%arg0: i32, %arg1: i32) -> (i32, i32) {
    %c0_i32 = arith.constant 0 : i32
    %c0_i32_0 = arith.constant 0 : i32
    return %arg0, %c0_i32 : i32, i32
  }
}

module attributes {stable_mosaic.version = 11 : i64} {
  func.func @_mm_kernel(%arg0: i32, %arg1: i32, %arg2: i32, %arg3: memref<16x128xbf16, #tpu.memory_space<vmem>>, %arg4: memref<128x128xbf16, #tpu.memory_space<vmem>>, %arg5: memref<16x128xf32, #tpu.memory_space<vmem>>, %arg6: memref<16x128xf32, #tpu.memory_space<vmem>>) attributes {dimension_semantics = [#tpu.dimension_semantics<parallel>, #tpu.dimension_semantics<parallel>, #tpu.dimension_semantics<arbitrary>], iteration_bounds = array<i64: 1, 1, 1>, scalar_prefetch = 0 : i64, scratch_operands = 1 : i64, tpu.core_type = #tpu.core_type<tc>, window_params = [{transform_indices = @transform_0, window_bounds = array<i64: 16, 128>}, {transform_indices = @transform_1, window_bounds = array<i64: 128, 128>}, {transform_indices = @transform_2, window_bounds = array<i64: 16, 128>}]} {
    %c0_i32 = arith.constant 0 : i32
    %0 = arith.cmpi eq, %arg2, %c0_i32 : i32
    %1 = arith.extui %0 : i1 to i32
    %c0_i32_0 = arith.constant 0 : i32
    %2 = arith.cmpi ne, %1, %c0_i32_0 : i32
    scf.if %2 {
      %cst_10 = arith.constant 0.000000e+00 : f32
      %12 = vector.broadcast %cst_10 : f32 to vector<16x128xf32>
      %c0_11 = arith.constant 0 : index
      %c0_12 = arith.constant 0 : index
      %13 = vector.load %arg6[%c0_11, %c0_12] : memref<16x128xf32, #tpu.memory_space<vmem>>, vector<16x128xf32>
      tpu.vector_store %arg6[%c0_11, %c0_12], %12 {strides = array<i32>} : memref<16x128xf32, #tpu.memory_space<vmem>>, vector<16x128xf32>,
    } else {
    }
    %c0 = arith.constant 0 : index
    %c0_1 = arith.constant 0 : index
    %3 = vector.load %arg6[%c0, %c0_1] : memref<16x128xf32, #tpu.memory_space<vmem>>, vector<16x128xf32>
    %c0_2 = arith.constant 0 : index
    %c0_3 = arith.constant 0 : index
    %4 = vector.load %arg3[%c0_2, %c0_3] : memref<16x128xbf16, #tpu.memory_space<vmem>>, vector<16x128xbf16>
    %c0_4 = arith.constant 0 : index
    %c0_5 = arith.constant 0 : index
    %5 = vector.load %arg4[%c0_4, %c0_5] : memref<128x128xbf16, #tpu.memory_space<vmem>>, vector<128x128xbf16>
    %cst = arith.constant dense<0.000000e+00> : vector<16x128xf32>
    %6 = tpu.matmul %4, %5, %cst {dimension_numbers = #tpu.dot_dimension_numbers<[1], [0], [0], [1], [0, 0, 1, 1], [], []>} : vector<16x128xbf16>, vector<128x128xbf16>, vector<16x128xf32> -> vector<16x128xf32>
    %7 = arith.addf %3, %6 : vector<16x128xf32>
    %c0_6 = arith.constant 0 : index
    %c0_7 = arith.constant 0 : index
    %8 = vector.load %arg6[%c0_6, %c0_7] : memref<16x128xf32, #tpu.memory_space<vmem>>, vector<16x128xf32>
    tpu.vector_store %arg6[%c0_6, %c0_7], %7 {strides = array<i32>} : memref<16x128xf32, #tpu.memory_space<vmem>>, vector<16x128xf32>,
    %c0_i32_8 = arith.constant 0 : i32
    %9 = arith.cmpi eq, %arg2, %c0_i32_8 : i32
    %10 = arith.extui %9 : i1 to i32
    %c0_i32_9 = arith.constant 0 : i32
    %11 = arith.cmpi ne, %10, %c0_i32_9 : i32
    scf.if %11 {
      %c0_10 = arith.constant 0 : index
      %c0_11 = arith.constant 0 : index
      %12 = vector.load %arg6[%c0_10, %c0_11] : memref<16x128xf32, #tpu.memory_space<vmem>>, vector<16x128xf32>
      %c0_12 = arith.constant 0 : index
      %c0_13 = arith.constant 0 : index
      %13 = vector.load %arg5[%c0_12, %c0_13] : memref<16x128xf32, #tpu.memory_space<vmem>>, vector<16x128xf32>
      tpu.vector_store %arg5[%c0_12, %c0_13], %12 {strides = array<i32>} : memref<16x128xf32, #tpu.memory_space<vmem>>, vector<16x128xf32>,
    } else {
    }
    return
  }
  func.func @transform_0(%arg0: i32, %arg1: i32, %arg2: i32) -> (i32, i32) {
    %c0_i32 = arith.constant 0 : i32
    return %arg0, %arg2 : i32, i32
  }
  func.func @transform_1(%arg0: i32, %arg1: i32, %arg2: i32) -> (i32, i32) {
    %c0_i32 = arith.constant 0 : i32
    return %arg2, %arg1 : i32, i32
  }
  func.func @transform_2(%arg0: i32, %arg1: i32, %arg2: i32) -> (i32, i32) {
    %c0_i32 = arith.constant 0 : i32
    return %arg0, %arg1 : i32, i32
  }
}

</mosaic_0001>

<bundles_post_ra>
// kernel: _lambda_.21
= control target key start
LH: loop header
LB: loop body
LE: loop exit
PB: predicated region body
PF: predicated region fallthrough
CT: control target
= control target key end

     0   :  { %s257_s0 = inlined_call_operand.vmem [shape: bf16[16,128], index: 0, kind: input, shape index: {}]   ;;  %s258_s1 = inlined_call_operand.vmem [shape: bf16[128,128], index: 1, kind: input, shape index: {}]   ;;  %s259_s2 = inlined_call_operand.hbm [shape: f32[16,128], index: 2, kind: output, shape index: {}]  }
   0x1   :  { %v179_v0 = vld [vmem:[%s258_s1 + $0x38] sm:$0xff]  ;;  %v178_v1 = vld [vmem:[%s258_s1 + $0x30] sm:$0xff] }
   0x2   :  { %92 = vmatpush.bf16.msra.mxu0 %v179_v0 }
   0x3   :  { %7 = vsyncpa [#allocation4], 0  ;;  %v177_v2 = vld [vmem:[%s258_s1 + $0x28] sm:$0xff]  ;;  %v176_v3 = vld [vmem:[%s258_s1 + $0x20] sm:$0xff]  ;;  %s209_s27 = smov [#allocation3]   ;;  %s123_s3 = sshll.u32 %s259_s2, 4  ;;  %s124_s3 = int_to_ptr.hbm [resolvable:$true] %s123_s3 }
   0x4   :  { %v175_v4 = vld [vmem:[%s258_s1 + $0x18] sm:$0xff]  ;;  %v174_v5 = vld [vmem:[%s258_s1 + $0x10] sm:$0xff]  ;;  %v173_v6 = vld [vmem:[%s258_s1 + $0x8] sm:$0xff]  ;;  %s121_s28 = sshll.u32 %s209_s27, 4  ;;  %s210_s4 = smov 128   ;;  %s122_s28 = int_to_ptr.vmem [resolvable:$true] %s121_s28 }
   0x5   :  { %v172_v7 = vld [vmem:[%s258_s1] sm:$0xff]  ;;  %s211_s1 = smov 8  }
   0x6   :  { %93 = vmatpush.bf16.msra.mxu0 %v178_v1  ;;  %v171_v8 = vld [vmem:[%s257_s0] sm:$0xff] }
   0xa   :  { %94 = vmatpush.bf16.msra.mxu0 %v177_v2 }
   0xe   :  { %95 = vmatpush.bf16.msra.mxu0 %v176_v3 }
  0x12   :  { %96 = vmatpush.bf16.msra.mxu0 %v175_v4 }
  0x16   :  { %97 = vmatpush.bf16.msra.mxu0 %v174_v5 }
  0x1a   :  { %98 = vmatpush.bf16.msra.mxu0 %v173_v6 }
  0x1e   :  { %99 = vmatpush.bf16.msra.mxu0 %v172_v7 }
  0x21   :  { %100 = vmatmul.bf16.vlgmr.msra.gmra.mxu0 %v171_v8 }
  0x9e   :  { %v101_v9 = vpop.f32.mrf.mxu0 }
  0x9f   :  { %115 = vst [vmem:[#allocation3] sm:$0xff] %v101_v9 }
  0xa6   :  { %v103_v10 = vpop.f32.mrf.mxu0 }
  0xa7   :  { %116 = vst [vmem:[#allocation3 + $0x8] sm:$0xff] %v103_v10 }
  0xa8   :  { %129 = dma.vmem_to_hbm [thread:$0]  %s122_s28, 256, %s124_s3, [#allocation4], %s210_s4, %s210_s4, %s211_s1  }
  0xa9   :  { %207 = dma.done.wait [#allocation4], 256  }
  0xaa   :  { %208 = vsyncadd [#allocation4], 4294967040 }
  0xab   :  { %134 = vsyncpa [#allocation4], 1 }

// kernel: _lambda_.12
= control target key start
LH: loop header
LB: loop body
LE: loop exit
PB: predicated region body
PF: predicated region fallthrough
CT: control target
= control target key end

     0   :  { %s778_s1 = inlined_call_operand.vmem [shape: bf16[128,256], index: 1, kind: input, shape index: {}]   ;;  %s779_s2 = inlined_call_operand.vmem [shape: bf16[256,128], index: 2, kind: input, shape index: {}]   ;;  %s780_s0 = inlined_call_operand.vmem [shape: bf16[16,128], index: 0, kind: input, shape index: {}]   ;;  %s781_s3 = inlined_call_operand.vmem [shape: f32[16,128], index: 3, kind: input, shape index: {}]   ;;  %s782_s4 = inlined_call_operand.vmem [shape: f32[1,128], index: 4, kind: input, shape index: {}]   ;;  %s783_s5 = inlined_call_operand.vmem [shape: f32[1,128], index: 5, kind: input, shape index: {}]   ;;  %s784_s6 = inlined_call_operand.vmem [shape: f32[16,128], index: 6, kind: output, shape index: {}]  }
   0x1   :  { %v465_v0 = vld [vmem:[%s778_s1 + $0x70] sm:$0xf]  ;;  %v551_v1 = vld [vmem:[%s778_s1 + $0x74] sm:$0xf0]  ;;  %v550_v2 = vld [vmem:[%s778_s1 + $0x74] sm:$0xf] }
   0x2   :  { %v466_v3 = vor.u32 %v551_v1, %v465_v0  ;;  %v467_v4 = vld [vmem:[%s778_s1 + $0x78] sm:$0xf0]  ;;  %v457_v5 = vld [vmem:[%s778_s1 + $0x60] sm:$0xf]  ;;  %v549_v6 = vld [vmem:[%s778_s1 + $0x64] sm:$0xf0] }
   0x3   :  { %v470_v7 = vor.u32 %v550_v2, %v467_v4  ;;  %v548_v8 = vld [vmem:[%s778_s1 + $0x64] sm:$0xf]  ;;  %v459_v9 = vld [vmem:[%s778_s1 + $0x68] sm:$0xf0]  ;;  %v458_v10 = vor.u32 %v549_v6, %v457_v5  ;;  %v449_v12 = vld [vmem:[%s778_s1 + $0x50] sm:$0xf] }
   0x4   :  { %133 = vmatpush.bf16.msra.mxu0 %v466_v3  ;;  %v462_v11 = vor.u32 %v548_v8, %v459_v9  ;;  %v547_v13 = vld [vmem:[%s778_s1 + $0x54] sm:$0xf0]  ;;  %v546_v14 = vld [vmem:[%s778_s1 + $0x54] sm:$0xf]  ;;  %v451_v15 = vld [vmem:[%s778_s1 + $0x58] sm:$0xf0] }
   0x5   :  { %147 = vmatpush.bf16.msra.mxu1 %v470_v7  ;;  %v450_v16 = vor.u32 %v547_v13, %v449_v12  ;;  %v454_v17 = vor.u32 %v546_v14, %v451_v15  ;;  %v441_v18 = vld [vmem:[%s778_s1 + $0x40] sm:$0xf]  ;;  %v545_v19 = vld [vmem:[%s778_s1 + $0x44] sm:$0xf0]  ;;  %v544_v20 = vld [vmem:[%s778_s1 + $0x44] sm:$0xf] }
   0x6   :  { %v443_v21 = vld [vmem:[%s778_s1 + $0x48] sm:$0xf0]  ;;  %v442_v22 = vor.u32 %v545_v19, %v441_v18  ;;  %v559_v23 = vld [vmem:[%s779_s2 + $0x38] sm:$0xff]  ;;  %v433_v26 = vld [vmem:[%s778_s1 + $0x30] sm:$0xf] }
   0x7   :  { %v567_v24 = vld [vmem:[%s779_s2 + $0x78] sm:$0xff]  ;;  %v446_v25 = vor.u32 %v544_v20, %v443_v21  ;;  %v542_v28 = vld [vmem:[%s778_s1 + $0x34] sm:$0xf]  ;;  %297 = vmatpush.bf16.msra.mxu2 %v559_v23  ;;  %v425_v34 = vld [vmem:[%s778_s1 + $0x20] sm:$0xf]  ;;  %v577_v21 = vmov 128.0  }
   0x8   :  { %134 = vmatpush.bf16.msra.mxu0 %v458_v10  ;;  %v543_v27 = vld [vmem:[%s778_s1 + $0x34] sm:$0xf0]  ;;  %v435_v29 = vld [vmem:[%s778_s1 + $0x38] sm:$0xf0]  ;;  %311 = vmatpush.bf16.msra.mxu3 %v567_v24  ;;  %v558_v30 = vld [vmem:[%s779_s2 + $0x30] sm:$0xff]  ;;  %571 = vrcp.f32 %v577_v21 }
   0x9   :  { %148 = vmatpush.bf16.msra.mxu1 %v462_v11  ;;  %v566_v31 = vld [vmem:[%s779_s2 + $0x70] sm:$0xff]  ;;  %v434_v32 = vor.u32 %v543_v27, %v433_v26  ;;  %v438_v33 = vor.u32 %v542_v28, %v435_v29  ;;  %v541_v35 = vld [vmem:[%s778_s1 + $0x24] sm:$0xf0]  ;;  %v540_v36 = vld [vmem:[%s778_s1 + $0x24] sm:$0xf] }
   0xa   :  { %v427_v37 = vld [vmem:[%s778_s1 + $0x28] sm:$0xf0]  ;;  %v426_v40 = vor.u32 %v541_v35, %v425_v34  ;;  %v417_v42 = vld [vmem:[%s778_s1 + $0x10] sm:$0xf]  ;;  %v539_v43 = vld [vmem:[%s778_s1 + $0x14] sm:$0xf0] }
   0xb   :  { %298 = vmatpush.bf16.msra.mxu2 %v558_v30  ;;  %v557_v38 = vld [vmem:[%s779_s2 + $0x28] sm:$0xff]  ;;  %v430_v41 = vor.u32 %v540_v36, %v427_v37  ;;  %v538_v44 = vld [vmem:[%s778_s1 + $0x14] sm:$0xf]  ;;  %v419_v45 = vld [vmem:[%s778_s1 + $0x18] sm:$0xf0]  ;;  %v418_v48 = vor.u32 %v539_v43, %v417_v42 }
   0xc   :  { %135 = vmatpush.bf16.msra.mxu0 %v450_v16  ;;  %312 = vmatpush.bf16.msra.mxu3 %v566_v31  ;;  %v565_v39 = vld [vmem:[%s779_s2 + $0x68] sm:$0xff]  ;;  %v556_v46 = vld [vmem:[%s779_s2 + $0x20] sm:$0xff]  ;;  %v422_v49 = vor.u32 %v538_v44, %v419_v45  ;;  %v555_v54 = vld [vmem:[%s779_s2 + $0x18] sm:$0xff] }
   0xd   :  { %149 = vmatpush.bf16.msra.mxu1 %v454_v17  ;;  %v564_v47 = vld [vmem:[%s779_s2 + $0x60] sm:$0xff]  ;;  %v537_v51 = vld [vmem:[%s778_s1 + $0x4] sm:$0xf0]  ;;  %v411_v53 = vld [vmem:[%s778_s1 + $0x8] sm:$0xf0] }
   0xe   :  { %v409_v50 = vld [vmem:[%s778_s1] sm:$0xf]  ;;  %v536_v52 = vld [vmem:[%s778_s1 + $0x4] sm:$0xf]  ;;  %v563_v55 = vld [vmem:[%s779_s2 + $0x58] sm:$0xff] }
   0xf   :  { %299 = vmatpush.bf16.msra.mxu2 %v557_v38  ;;  %v410_v56 = vor.u32 %v537_v51, %v409_v50  ;;  %v414_v57 = vor.u32 %v536_v52, %v411_v53  ;;  %v535_v58 = vld [vmem:[%s780_s0] sm:$0xff]  ;;  %v554_v59 = vld [vmem:[%s779_s2 + $0x10] sm:$0xff]  ;;  %v553_v61 = vld [vmem:[%s779_s2 + $0x8] sm:$0xff] }
  0x10   :  { %136 = vmatpush.bf16.msra.mxu0 %v442_v22  ;;  %313 = vmatpush.bf16.msra.mxu3 %v565_v39  ;;  %v562_v60 = vld [vmem:[%s779_s2 + $0x50] sm:$0xff]  ;;  %v561_v62 = vld [vmem:[%s779_s2 + $0x48] sm:$0xff]  ;;  %v552_v63 = vld [vmem:[%s779_s2] sm:$0xff]  ;;  %v572_v22 = vpop.eup %571 }
  0x11   :  { %150 = vmatpush.bf16.msra.mxu1 %v446_v25  ;;  %v560_v0 = vld [vmem:[%s779_s2 + $0x40] sm:$0xff]  ;;  %v335_v18 = vld [vmem:[%s781_s3 + $0x8] sm:$0xff]  ;;  %v343_v23 = vmul.f32 128.0, %v572_v22  ;;  %vm347_vm0 = vweird.f32 %v572_v22 }
  0x12   :  { %v334_v13 = vld [vmem:[%s781_s3] sm:$0xff] }
  0x13   :  { %300 = vmatpush.bf16.msra.mxu2 %v556_v46  ;;  %v344_v24 = vsub.f32 1.0, %v343_v23  ;;  %v569_v50 = vld [vmem:[%s782_s4] ss:$0 sm:$0xff] }
  0x14   :  { %137 = vmatpush.bf16.msra.mxu0 %v434_v32  ;;  %314 = vmatpush.bf16.msra.mxu3 %v564_v47  ;;  %v570_v53 = vld [vmem:[%s783_s5] ss:$0 sm:$0xff] }
  0x15   :  { %151 = vmatpush.bf16.msra.mxu1 %v438_v33  ;;  %v345_v25 = vmul.f32 %v572_v22, %v344_v24 }
  0x17   :  { %301 = vmatpush.bf16.msra.mxu2 %v555_v54  ;;  %v346_v26 = vadd.f32 %v572_v22, %v345_v25 }
  0x18   :  { %138 = vmatpush.bf16.msra.mxu0 %v426_v40  ;;  %315 = vmatpush.bf16.msra.mxu3 %v563_v55 }
  0x19   :  { %152 = vmatpush.bf16.msra.mxu1 %v430_v41  ;;  %v348_v27 = vsel %vm347_vm0, %v572_v22, %v346_v26 }
  0x1b   :  { %302 = vmatpush.bf16.msra.mxu2 %v554_v59 }
  0x1c   :  { %139 = vmatpush.bf16.msra.mxu0 %v418_v48  ;;  %316 = vmatpush.bf16.msra.mxu3 %v562_v60 }
  0x1d   :  { %153 = vmatpush.bf16.msra.mxu1 %v422_v49 }
  0x1f   :  { %303 = vmatpush.bf16.msra.mxu2 %v553_v61 }
  0x20   :  { %140 = vmatpush.bf16.msra.mxu0 %v410_v56  ;;  %317 = vmatpush.bf16.msra.mxu3 %v561_v62 }
  0x21   :  { %154 = vmatpush.bf16.msra.mxu1 %v414_v57 }
  0x23   :  { %141 = vmatmul.bf16.vlgmr.msra.gmra.mxu0 %v535_v58  ;;  %304 = vmatpush.bf16.msra.mxu2 %v552_v63 }
  0x24   :  { %155 = vmatmul.bf16.vlgmr.msra.gmra.mxu1 %v535_v58  ;;  %318 = vmatpush.bf16.msra.mxu3 %v560_v0 }
  0xa0   :  { %v142_v1 = vpop.f32.mrf.mxu0 }
  0xa1   :  { %v156_v2 = vpop.f32.mrf.mxu1  ;;  %v161_v4 = vmax.f32 %v142_v1, 0.0 }
  0xa2   :  { %v162_v7 = vmax.f32 %v156_v2, 0.0 }
  0xa8   :  { %v144_v3 = vpop.f32.mrf.mxu0 }
  0xa9   :  { %v163_v5 = vmax.f32 %v144_v3, 0.0  ;;  %v158_v6 = vpop.f32.mrf.mxu1 }
  0xaa   :  { %v164_v8 = vmax.f32 %v158_v6, 0.0 }
  0xab   :  { %v165_v9 = vpack.c.bf16 %v163_v5, %v161_v4 }
  0xac   :  { %v166_v10 = vpack.c.bf16 %v164_v8, %v162_v7 }
  0xad   :  { %305 = vmatmul.bf16.vlgmr.msra.gmra.mxu2 %v165_v9 }
  0xae   :  { %319 = vmatmul.bf16.vlgmr.msra.gmra.mxu3 %v166_v10 }
 0x130   :  { %v306_v11 = vpop.f32.mrf.mxu2 }
 0x131   :  { %v320_v12 = vpop.f32.mrf.mxu3 }
 0x132   :  { %v321_v14 = vadd.f32 %v320_v12, %v306_v11 }
 0x134   :  { %v336_v15 = vadd.f32 %v334_v13, %v321_v14 }
 0x136   :  { %338 = vadd.xlane.f32.xlu0 %v336_v15 }
 0x138   :  { %v308_v16 = vpop.f32.mrf.mxu2 }
 0x139   :  { %v322_v17 = vpop.f32.mrf.mxu3 }
 0x13a   :  { %v323_v19 = vadd.f32 %v322_v17, %v308_v16 }
 0x13c   :  { %v337_v20 = vadd.f32 %v335_v18, %v323_v19 }
 0x13e   :  { %340 = vadd.xlane.f32.xlu0 %v337_v20 }
 0x1a9   :  { %v339_v28 = vpop.xlane.xlu0 %338 }
 0x1aa   :  { %v349_v29 = vmul.f32 %v348_v27, %v339_v28 }
 0x1ac   :  { %v351_v30 = vsub.f32 %v336_v15, %v349_v29 }
 0x1ae   :  { %v353_v31 = vmul.f32 %v351_v30, %v351_v30 }
 0x1b0   :  { %355 = vadd.xlane.f32.xlu1 %v353_v31 }
 0x1b1   :  { %v341_v32 = vpop.xlane.xlu0 %340 }
 0x1b2   :  { %v350_v33 = vmul.f32 %v348_v27, %v341_v32 }
 0x1b4   :  { %v352_v34 = vsub.f32 %v337_v20, %v350_v33 }
 0x1b6   :  { %v354_v35 = vmul.f32 %v352_v34, %v352_v34 }
 0x1b8   :  { %357 = vadd.xlane.f32.xlu1 %v354_v35 }
 0x223   :  { %v356_v36 = vpop.xlane.xlu1 %355 }
 0x224   :  { %v359_v37 = vmul.f32 %v356_v36, %v348_v27 }
 0x226   :  { %v361_v38 = vadd.f32 1e-05, %v359_v37 }
 0x228   :  { %573 = vrsqrt.f32 %v361_v38  ;;  %vm369_vm2 = vweird.f32 %v361_v38 }
 0x22b   :  { %v358_v39 = vpop.xlane.xlu1 %357 }
 0x22c   :  { %v360_v40 = vmul.f32 %v358_v39, %v348_v27 }
 0x22e   :  { %v574_v41 = vpop.eup %573  ;;  %v362_v42 = vadd.f32 1e-05, %v360_v40 }
 0x22f   :  { %v364_v43 = vmul.f32 %v574_v41, %v361_v38  ;;  %vm370_vm1 = vweird.f32 %v574_v41 }
 0x230   :  { %575 = vrsqrt.f32 %v362_v42  ;;  %vm371_vm3 = vmor %vm369_vm2, %vm370_vm1  ;;  %vm379_vm5 = vweird.f32 %v362_v42 }
 0x231   :  { %v365_v44 = vmul.f32 %v574_v41, %v364_v43 }
 0x233   :  { %v366_v45 = vmul.f32 0.5, %v365_v44 }
 0x235   :  { %v367_v46 = vsub.f32 1.5, %v366_v45 }
 0x236   :  { %v576_v47 = vpop.eup %575 }
 0x237   :  { %v368_v48 = vmul.f32 %v574_v41, %v367_v46  ;;  %v374_v49 = vmul.f32 %v576_v47, %v362_v42  ;;  %vm380_vm4 = vweird.f32 %v576_v47 }
 0x238   :  { %vm381_vm6 = vmor %vm379_vm5, %vm380_vm4 }
 0x239   :  { %v372_v51 = vsel %vm371_vm3, %v574_v41, %v368_v48  ;;  %v375_v52 = vmul.f32 %v576_v47, %v374_v49 }
 0x23a   :  { %v383_v54 = vmul.f32 %v372_v51, %v351_v30 }
 0x23b   :  { %v376_v55 = vmul.f32 0.5, %v375_v52 }
 0x23c   :  { %v389_v56 = vmul.f32 %v569_v50, %v383_v54 }
 0x23d   :  { %v377_v57 = vsub.f32 1.5, %v376_v55 }
 0x23e   :  { %v395_v58 = vadd.f32 %v570_v53, %v389_v56 }
 0x23f   :  { %v378_v59 = vmul.f32 %v576_v47, %v377_v57 }
 0x240   :  { %397 = vst [vmem:[%s784_s6] sm:$0xff] %v395_v58 }
 0x241   :  { %v382_v60 = vsel %vm381_vm6, %v576_v47, %v378_v59 }
 0x242   :  { %v384_v61 = vmul.f32 %v382_v60, %v352_v34 }
 0x244   :  { %v390_v62 = vmul.f32 %v569_v50, %v384_v61 }
 0x246   :  { %v396_v63 = vadd.f32 %v570_v53, %v390_v62 }
 0x248   :  { %398 = vst [vmem:[%s784_s6 + $0x8] sm:$0xff] %v396_v63 }

// kernel: _lambda_.11
= control target key start
LH: loop header
LB: loop body
LE: loop exit
PB: predicated region body
PF: predicated region fallthrough
CT: control target
= control target key end

     0   :  { %s1775_s0 = inlined_call_operand.vmem [shape: f32[2,8,128], index: 0, kind: input, shape index: {}, may-alias: {0,1}]   ;;  %s1776_s1 = inlined_call_operand.vmem [shape: f32[2,8,128], index: 1, kind: input, shape index: {}, may-alias: {0,1}]   ;;  %s1777_s2 = inlined_call_operand.vmem [shape: bf16[2,8,8], index: 2, kind: input, shape index: {}]   ;;  %s1778_s3 = inlined_call_operand.vmem [shape: bf16[128,128], index: 3, kind: input, shape index: {}]   ;;  %s1779_s4 = inlined_call_operand.vmem [shape: bf16[128,256], index: 4, kind: input, shape index: {}]   ;;  %s1780_s5 = inlined_call_operand.vmem [shape: bf16[128,128], index: 5, kind: input, shape index: {}]   ;;  %s1781_s6 = inlined_call_operand.vmem [shape: f32[1,128], index: 6, kind: input, shape index: {}]   ;;  %s1782_s7 = inlined_call_operand.vmem [shape: f32[1,128], index: 7, kind: input, shape index: {}]   ;;  %s1783_s8 = inlined_call_operand.vmem [shape: f32[2,8,128], index: 8, kind: output, shape index: {0}]   ;;  %s1784_s9 = inlined_call_operand.hbm [shape: f32[2,4,8,8], index: 9, kind: output, shape index: {1}]  }
   0x1   :  { %1786 = sst [smem:[#allocation7_spill]] %s1775_s0 }
   0x2   :  { %15 = vsyncpa [#allocation3], 0 }
   0x3   :  { %17 = vsyncpa [#allocation3 + $0x1], 0  ;;  %s1458_s30 = smov 0   ;;  %s1460_s10 = smov 0  }
   0x4   :  { %s1462_s11 = smov 0   ;;  %s1464_s12 = smov 0  }
   0x5 LB: > { %1787 = sst [smem:[#allocation5_spill]] %s1396_s11  ;;  %s1479_s13 = sadd.s32 4294967295, %s1400_s12   ;;  %s1400_s12 = sphi %s1464_s12, %s1796_s12   ;;  %s1396_s11 = sphi %s1462_s11, %s1793_s11   ;;  %s1392_s10 = sphi %s1460_s10, %s1795_s10   ;;  %s1388_s30 = sphi %s1458_s30, %s1794_s30  }
   0x6   : > { %s1085_s14 = sadd.s32 4294967294, %s1400_s12   ;;  %s1483_s15 = sadd.s32 1, %s1400_s12  }
   0x7   : > { %s239_s16 = sadd.s32 1, %s1396_s11  ;;  %s236_s17 = ssub.s32 %s1400_s12, %s1483_s15 }
   0x8   : > { %p249_p0 = scmp.ne.s32.totalorder %s1396_s11, %s1392_s10  ;;  %p237_p1 = scmp.eq.s32.totalorder %s236_s17, 0 }
   0x9   : > { %p250_p2 = scmp.eq.s32.totalorder %s1479_s13, 1  ;;  %p255_p3 = scmp.ne.s32.totalorder %s1392_s10, %s1388_s30 }
   0xa   : > { %p256_p4 = scmp.eq.s32.totalorder %s1085_s14, 1  ;;  %p1088_p7 = scmp.ge.s32.totalorder %s1400_s12, 1 }
   0xb   : > { %s1494_s18 = scalar_select %p237_p1, %s1396_s11, %s239_s16  }
   0xc   : > { %p1496_p5 = por %p250_p2, %p249_p0  ;;  %p1500_p6 = por %p256_p4, %p255_p3 }
   0xd   : > { %1788 = sst [smem:[#allocation6_spill]] %s1494_s18  ;;  %p310_p8 = scmp.lt.s32.totalorder %s1400_s12, 3 }
   0xf   : > { %p311_p9 = pnand %p1088_p7, %p310_p8 }
  0x10   : > { %p357_p10 = scmp.lt.s32.totalorder (!%p311_p9), %s1479_s13, 1  ;;  %s1791_s0 = sld [smem:[#allocation7_spill]] (!%p311_p9) }
  0x11   : > { %314 = sbr.rel (%p311_p9) target bundleno = 1661 (0x67d), region = 52  ;;  %s1402_s26 = smov (!%p311_p9), 64  }
  0x12   : > { %s1403_s27 = smov (!%p311_p9), 96   ;;  %s1404_s18 = smov (!%p311_p9), 32  }
  0x16   : > { %v1245_v0 = vld [vmem:[%s1778_s3 + $0x38] sm:$0xff]  ;;  %v1184_v1 = vld [vmem:[%s1779_s4 + $0x70] sm:$0xf]  ;;  %v1176_v4 = vld [vmem:[%s1779_s4 + $0x60] sm:$0xf]  ;;  %s1577_s16 = scalar_select %p357_p10, %s1479_s13, 1 }
  0x17   : > { %v1261_v2 = vld [vmem:[%s1779_s4 + $0x74] sm:$0xf0]  ;;  %v1259_v5 = vld [vmem:[%s1779_s4 + $0x64] sm:$0xf0]  ;;  %442 = vmatpush.bf16.msra.mxu0 %v1245_v0  ;;  %v1244_v6 = vld [vmem:[%s1778_s3 + $0x30] sm:$0xff]  ;;  %vm582_vm0 = vcmask 261120  }
  0x18   : > { %v1185_v3 = vor.u32 %v1261_v2, %v1184_v1  ;;  %v1177_v7 = vor.u32 %v1259_v5, %v1176_v4  ;;  %v1168_v8 = vld [vmem:[%s1779_s4 + $0x50] sm:$0xf]  ;;  %v1257_v9 = vld [vmem:[%s1779_s4 + $0x54] sm:$0xf0]  ;;  %v1243_v10 = vld [vmem:[%s1778_s3 + $0x28] sm:$0xff]  ;;  %s1595_s14 = sshll.u32 %s1577_s16, 3 }
  0x19   : > { %v1169_v11 = vor.u32 %v1257_v9, %v1168_v8  ;;  %v1160_v12 = vld [vmem:[%s1779_s4 + $0x40] sm:$0xf]  ;;  %v1255_v13 = vld [vmem:[%s1779_s4 + $0x44] sm:$0xf0]  ;;  %v1260_v14 = vld [vmem:[%s1779_s4 + $0x74] sm:$0xf]  ;;  %s360_s28 = scalar_lea.vmem %s1791_s0, %s1595_s14  ;;  %s364_s11 = scalar_lea.vmem %s1776_s1, %s1595_s14 }
  0x1a   : > { %552 = vmatpush.bf16.msra.mxu1 %v1185_v3  ;;  %v1186_v15 = vld [vmem:[%s1779_s4 + $0x78] sm:$0xf0]  ;;  %v1258_v16 = vld [vmem:[%s1779_s4 + $0x64] sm:$0xf]  ;;  %v1178_v17 = vld [vmem:[%s1779_s4 + $0x68] sm:$0xf0]  ;;  %v1161_v20 = vor.u32 %v1255_v13, %v1160_v12 }
  0x1b   : > { %443 = vmatpush.bf16.msra.mxu0 %v1244_v6  ;;  %v1242_v18 = vld [vmem:[%s1778_s3 + $0x20] sm:$0xff]  ;;  %v1189_v19 = vor.u32 %v1260_v14, %v1186_v15  ;;  %v1152_v21 = vld [vmem:[%s1779_s4 + $0x30] sm:$0xf]  ;;  %v1253_v22 = vld [vmem:[%s1779_s4 + $0x34] sm:$0xf0]  ;;  %v1181_v23 = vor.u32 %v1258_v16, %v1178_v17  ;;  %vm619_vm1 = vcmask 1043456  }
  0x1c   : > { %v1256_v24 = vld [vmem:[%s1779_s4 + $0x54] sm:$0xf]  ;;  %v1170_v25 = vld [vmem:[%s1779_s4 + $0x58] sm:$0xf0]  ;;  %v1153_v27 = vor.u32 %v1253_v22, %v1152_v21  ;;  %v1144_v28 = vld [vmem:[%s1779_s4 + $0x20] sm:$0xf] }
  0x1d   : > { %565 = vmatpush.bf16.msra.mxu2 %v1189_v19  ;;  %v1241_v26 = vld [vmem:[%s1778_s3 + $0x18] sm:$0xff]  ;;  %v1251_v29 = vld [vmem:[%s1779_s4 + $0x24] sm:$0xf0]  ;;  %v1173_v30 = vor.u32 %v1256_v24, %v1170_v25  ;;  %v1254_v31 = vld [vmem:[%s1779_s4 + $0x44] sm:$0xf]  ;;  %s1092_s29 = sshll.u32 %s1577_s16, 2 }
  0x1e   : > { %553 = vmatpush.bf16.msra.mxu1 %v1177_v7  ;;  %v1162_v32 = vld [vmem:[%s1779_s4 + $0x48] sm:$0xf0]  ;;  %v1240_v33 = vld [vmem:[%s1778_s3 + $0x10] sm:$0xff]  ;;  %v1145_v34 = vor.u32 %v1251_v29, %v1144_v28  ;;  %v1249_v36 = vld [vmem:[%s1779_s4 + $0x14] sm:$0xf0]  ;;  %s368_s22 = scalar_lea.vmem %s1777_s2, %s1092_s29  ;;  %vm602_vm2 = vcmask 64512  }
  0x1f   : > { %444 = vmatpush.bf16.msra.mxu0 %v1243_v10  ;;  %v1136_v35 = vld [vmem:[%s1779_s4 + $0x10] sm:$0xf]  ;;  %v1165_v37 = vor.u32 %v1254_v31, %v1162_v32  ;;  %v1252_v38 = vld [vmem:[%s1779_s4 + $0x34] sm:$0xf]  ;;  %v1154_v39 = vld [vmem:[%s1779_s4 + $0x38] sm:$0xf0] }
  0x20   : > { %v1239_v40 = vld [vmem:[%s1778_s3 + $0x8] sm:$0xff]  ;;  %v1137_v41 = vor.u32 %v1249_v36, %v1136_v35  ;;  %v1128_v42 = vld [vmem:[%s1779_s4] sm:$0xf]  ;;  %v1157_v44 = vor.u32 %v1252_v38, %v1154_v39  ;;  %v1250_v45 = vld [vmem:[%s1779_s4 + $0x24] sm:$0xf]  ;;  %s354_s16 = sand.u32 1, %s1392_s10  }
  0x21   : > { %566 = vmatpush.bf16.msra.mxu2 %v1181_v23  ;;  %v1247_v43 = vld [vmem:[%s1779_s4 + $0x4] sm:$0xf0]  ;;  %v1146_v46 = vld [vmem:[%s1779_s4 + $0x28] sm:$0xf0]  ;;  %v1238_v47 = vld [vmem:[%s1778_s3] sm:$0xff]  ;;  %s1089_s23 = sshll.u32 %s354_s16, 5 }
  0x22   : > { %554 = vmatpush.bf16.msra.mxu1 %v1169_v11  ;;  %v1629_v48 = vld [vmem:[%s360_s28] sm:$0xff]  ;;  %v1129_v49 = vor.u32 %v1247_v43, %v1128_v42  ;;  %v1149_v51 = vor.u32 %v1250_v45, %v1146_v46  ;;  %v1248_v53 = vld [vmem:[%s1779_s4 + $0x14] sm:$0xf]  ;;  %v1138_v54 = vld [vmem:[%s1779_s4 + $0x18] sm:$0xf0]  ;;  %vm832_vm3 = vcmask 523264  }
  0x23   : > { %445 = vmatpush.bf16.msra.mxu0 %v1242_v18  ;;  %v376_v50 = vld [vmem:[%s364_s11] sm:$0xff]  ;;  %v375_v52 = vpack.c.bf16 %v1629_v48, %v1629_v48  ;;  %v1141_v56 = vor.u32 %v1248_v53, %v1138_v54  ;;  %v1130_v58 = vld [vmem:[%s1779_s4 + $0x8] sm:$0xf0]  ;;  %s1668_s11 = scalar_lea.vmem [#allocation2], %s1089_s23  ;;  %vm834_vm4 = vcmask 785408   ;;  %s957_s28 = scalar_lea.sflag [#allocation3], %s354_s16 }
  0x24   : > { %v377_v55 = vpack.c.bf16 %v376_v50, %v376_v50  ;;  %v1246_v57 = vld [vmem:[%s1779_s4 + $0x4] sm:$0xf]  ;;  %v580_v15 = vld [vmem:[%s368_s22] sm:$0xf]  ;;  %s972_s22 = sshll.u32 %s1668_s11, 4  ;;  %s973_s22 = int_to_ptr.vmem [resolvable:$true] %s972_s22 }
  0x25   : > { %567 = vmatpush.bf16.msra.mxu2 %v1173_v30  ;;  %v1133_v59 = vor.u32 %v1246_v57, %v1130_v58  ;;  %v581_v16 = vunpack.c.l.bf16 %v580_v15 }
  0x26   : > { %555 = vmatpush.bf16.msra.mxu1 %v1161_v20 }
  0x27   : > { %446 = vmatpush.bf16.msra.mxu0 %v1241_v26 }
  0x29   : > { %568 = vmatpush.bf16.msra.mxu2 %v1165_v37 }
  0x2a   : > { %556 = vmatpush.bf16.msra.mxu1 %v1153_v27 }
  0x2b   : > { %447 = vmatpush.bf16.msra.mxu0 %v1240_v33 }
  0x2d   : > { %569 = vmatpush.bf16.msra.mxu2 %v1157_v44 }
  0x2e   : > { %557 = vmatpush.bf16.msra.mxu1 %v1145_v34 }
  0x2f   : > { %448 = vmatpush.bf16.msra.mxu0 %v1239_v40 }
  0x31   : > { %570 = vmatpush.bf16.msra.mxu2 %v1149_v51 }
  0x32   : > { %558 = vmatpush.bf16.msra.mxu1 %v1137_v41 }
  0x33   : > { %449 = vmatpush.bf16.msra.mxu0 %v1238_v47 }
  0x35   : > { %571 = vmatpush.bf16.msra.mxu2 %v1141_v56 }
  0x36   : > { %559 = vmatpush.bf16.msra.mxu1 %v1129_v49  ;;  %450 = vmatmul.bf16.vlgmr.msra.gmra.mxu0 %v375_v52 }
  0x39   : > { %560 = vmatmul.bf16.vlgmr.msra.gmra.mxu1 %v377_v55  ;;  %572 = vmatpush.bf16.msra.mxu2 %v1133_v59 }
  0x3c   : > { %573 = vmatmul.bf16.vlgmr.msra.gmra.mxu2 %v377_v55 }
  0xb3   : > { %v451_v60 = vpop.f32.mrf.mxu0 }
  0xb4   : > { %v455_v63 = vpack.c.bf16 %v451_v60, %v451_v60 }
  0xb6   : > { %v561_v61 = vpop.f32.mrf.mxu1  ;;  %v637_v3 = vunpack.c.l.b16 %v455_v63 }
  0xb7   : > { %v578_v62 = vpack.c.bf16 %v561_v61, %v561_v61 }
  0xb8   : > { %v638_v6 = vpack.c.b16 %v637_v3, %v637_v3 }
  0xb9   : > { %v642_v0 = vunpack.c.l.b16 %v578_v62  ;;  %v587_v1 = vsel %vm582_vm0, %v578_v62, 0 }
  0xba   : > { %596 = vmatpush.bf16.xpose.msra.mxu3 %v587_v1 }
  0xbb   : > { %v643_v2 = vpack.c.b16 %v642_v0, %v642_v0  ;;  %v453_v4 = vpop.f32.mrf.mxu0 }
  0xbd   : > { %705 = vrot.lane.b32.xlu2 %v643_v2, %s1402_s26  ;;  %644 = vrot.lane.b32.xlu1 %v643_v2, %s1403_s27 }
  0xbe   : > { %v563_v5 = vpop.f32.mrf.mxu1 }
  0xbf   : > { %v574_v7 = vpop.f32.mrf.mxu2 }
  0xc0   : > { %v1652_v9 = vpack.c.bf16 %v574_v7, %v574_v7 }
  0xc1   : > { %1190 = vmatmul.msk.bf16.vlgmr.msra.gmra.mxu3 %vm582_vm0, %v455_v63 }
  0xc2   : > { %v621_v10 = vsel %vm619_vm1, %v1652_v9, 0  ;;  %v680_v50 = vunpack.c.l.b16 %v1652_v9 }
  0xc3   : > { %630 = vmatpush.bf16.msrb.mxu3 %v621_v10 }
  0xc4   : > { %v681_v51 = vpack.c.b16 %v680_v50, %v680_v50 }
  0xc5   : > { %763 = vrot.lane.b32.xlu2 %v643_v2, %s1404_s18  ;;  %639 = vrot.lane.b32.xlu1 %v638_v6, %s1403_s27 }
  0xc7   : > { %v576_v8 = vpop.f32.mrf.mxu2 }
  0xcd   : > { %761 = vrot.lane.b32.xlu1 %v638_v6, %s1404_s18 }
 0x117   : > { %v706_v11 = vpop.permute.xlu2 %705 }
 0x118   : > { %v711_v12 = vsel %vm582_vm0, %v706_v11, 0 }
 0x119   : > { %720 = vmatpush.bf16.xpose.msrb.mxu2 %v711_v12 }
 0x11f   : > { %v764_v29 = vpop.permute.xlu2 %763 }
 0x120   : > { %v769_v31 = vsel %vm582_vm0, %v764_v29, 0  ;;  %v1267_v29 = vld [vmem:[%s1780_s5 + $0x28] sm:$0xff] }
 0x12f   : > { %v645_v13 = vpop.permute.xlu1 %644 }
 0x130   : > { %v650_v14 = vsel %vm582_vm0, %v645_v13, 0 }
 0x131   : > { %659 = vmatpush.bf16.xpose.msra.mxu3 %v650_v14 }
 0x137   : > { %v640_v33 = vpop.permute.xlu1 %639 }
 0x13f   : > { %v762_v34 = vpop.permute.xlu1 %761 }
 0x144   : > { %v598_v17 = vpop.f32.mrf.mxu3 }
 0x145   : > { %v599_v18 = vadd.f32 %v598_v17, %v581_v16 }
 0x147   : > { %v603_v19 = vsel %vm602_vm2, %v599_v18, -inf }
 0x148   : > { %604 = vmax.xlane.f32.xlu0 %v603_v19 }
 0x14c   : > { %v600_v20 = vpop.f32.mrf.mxu3 }
 0x1bb   : > { %v605_v21 = vpop.xlane.xlu0 %604 }
 0x1bc   : > { %v606_v22 = vsub.f32 %v599_v18, %v605_v21 }
 0x1be   : > { %v607_v23 = vmul.f32 1.442695, %v606_v22 }
 0x1c0   : > { %1318 = vpow2.f32 %v607_v23 }
 0x1c6   : > { %v1319_v24 = vpop.eup %1318 }
 0x1c7   : > { %v609_v25 = vsel %vm602_vm2, %v1319_v24, 0.0 }
 0x1c8   : > { %610 = vadd.xlane.f32.xlu0 %v609_v25 }
 0x1dc   : > { %703 = vrot.lane.b32.xlu0 %v638_v6, %s1402_s26 }
 0x23b   : > { %v611_v26 = vpop.xlane.xlu0 %610 }
 0x23c   : > { %1320 = vrcp.f32 %v611_v26 }
 0x242   : > { %v1321_v27 = vpop.eup %1320 }
 0x243   : > { %v613_v28 = vmul.f32 %v1321_v27, %v1319_v24  ;;  %v1269_v27 = vld [vmem:[%s1780_s5 + $0x38] sm:$0xff] }
 0x244   : > { %901 = vmatpush.bf16.msrb.mxu1 %v1269_v27 }
 0x245   : > { %614 = vst.msk [vmem:[%s1668_s11] sm:$0xff] %vm602_vm2, %v613_v28  ;;  %v615_v30 = vpack.c.bf16 %v613_v28, %v613_v28  ;;  %v1268_v28 = vld [vmem:[%s1780_s5 + $0x30] sm:$0xff] }
 0x247   : > { %1191 = vmatmul.msk.bf16.vlgmr.msrb.gmra.mxu3 %vm602_vm2, %v615_v30  ;;  %v1266_v30 = vld [vmem:[%s1780_s5 + $0x20] sm:$0xff] }
 0x248   : > { %778 = vmatpush.bf16.xpose.msrb.mxu3 %v769_v31  ;;  %902 = vmatpush.bf16.msrb.mxu1 %v1268_v28  ;;  %v1265_v31 = vld [vmem:[%s1780_s5 + $0x18] sm:$0xff] }
 0x24c   : > { %903 = vmatpush.bf16.msrb.mxu1 %v1267_v29 }
 0x24e   : > { %v704_v32 = vpop.permute.xlu0 %703 }
 0x24f   : > { %1195 = vmatmul.msk.bf16.vlgmr.msrb.gmra.mxu2 %vm582_vm0, %v704_v32  ;;  %v1264_v32 = vld [vmem:[%s1780_s5 + $0x10] sm:$0xff] }
 0x250   : > { %904 = vmatpush.bf16.msrb.mxu1 %v1266_v30 }
 0x254   : > { %905 = vmatpush.bf16.msrb.mxu1 %v1265_v31 }
 0x257   : > { %1192 = vmatmul.msk.bf16.vlgmr.msra.gmra.mxu3 %vm582_vm0, %v640_v33  ;;  %v1263_v33 = vld [vmem:[%s1780_s5 + $0x8] sm:$0xff] }
 0x258   : > { %906 = vmatpush.bf16.msrb.mxu1 %v1264_v32 }
 0x25c   : > { %907 = vmatpush.bf16.msrb.mxu1 %v1263_v33 }
 0x267   : > { %1198 = vmatmul.msk.bf16.vlgmr.msrb.gmra.mxu3 %vm582_vm0, %v762_v34  ;;  %v1262_v34 = vld [vmem:[%s1780_s5] sm:$0xff] }
 0x268   : > { %908 = vmatpush.bf16.msrb.mxu1 %v1262_v34 }
 0x2ca   : > { %v1677_v35 = vpop.f32.mrf.mxu3 }
 0x2d2   : > { %v634_v36 = vpop.f32.mrf.mxu3  ;;  %v722_v37 = vpop.f32.mrf.mxu2 }
 0x2d3   : > { %v723_v38 = vadd.f32 %v722_v37, %v581_v16 }
 0x2d5   : > { %v726_v39 = vsel %vm602_vm2, %v723_v38, -inf }
 0x2d6   : > { %727 = vmax.xlane.f32.xlu1 %v726_v39 }
 0x2da   : > { %v661_v40 = vpop.f32.mrf.mxu3  ;;  %v724_v41 = vpop.f32.mrf.mxu2 }
 0x2db   : > { %v662_v42 = vadd.f32 %v661_v40, %v581_v16 }
 0x2dd   : > { %v665_v43 = vsel %vm602_vm2, %v662_v42, -inf }
 0x2de   : > { %666 = vmax.xlane.f32.xlu2 %v665_v43 }
 0x2e2   : > { %v663_v44 = vpop.f32.mrf.mxu3 }
 0x2ea   : > { %v780_v45 = vpop.f32.mrf.mxu3 }
 0x2eb   : > { %v781_v46 = vadd.f32 %v780_v45, %v581_v16 }
 0x2ed   : > { %v784_v47 = vsel %vm602_vm2, %v781_v46, -inf }
 0x2ee   : > { %785 = vmax.xlane.f32.xlu0 %v784_v47 }
 0x2f2   : > { %v782_v49 = vpop.f32.mrf.mxu3 }
 0x302   : > { %740 = vrot.lane.b32.xlu0 %v681_v51, %s1402_s26 }
 0x349   : > { %v728_v52 = vpop.xlane.xlu1 %727 }
 0x34a   : > { %v729_v53 = vsub.f32 %v723_v38, %v728_v52 }
 0x34c   : > { %v730_v54 = vmul.f32 1.442695, %v729_v53 }
 0x34e   : > { %1322 = vpow2.f32 %v730_v54 }
 0x351   : > { %v667_v55 = vpop.xlane.xlu2 %666 }
 0x352   : > { %v668_v56 = vsub.f32 %v662_v42, %v667_v55 }
 0x354   : > { %v1323_v57 = vpop.eup %1322  ;;  %v669_v58 = vmul.f32 1.442695, %v668_v56 }
 0x355   : > { %v732_v59 = vsel %vm602_vm2, %v1323_v57, 0.0 }
 0x356   : > { %1324 = vpow2.f32 %v669_v58  ;;  %733 = vadd.xlane.f32.xlu1 %v732_v59 }
 0x35c   : > { %v1325_v60 = vpop.eup %1324 }
 0x35d   : > { %v671_v61 = vsel %vm602_vm2, %v1325_v60, 0.0 }
 0x35e   : > { %672 = vadd.xlane.f32.xlu2 %v671_v61 }
 0x361   : > { %v786_v62 = vpop.xlane.xlu0 %785 }
 0x362   : > { %v787_v63 = vsub.f32 %v781_v46, %v786_v62  ;;  %v1405_v46 = vmov 128.0  }
 0x364   : > { %v788_v0 = vmul.f32 1.442695, %v787_v63 }
 0x366   : > { %1326 = vpow2.f32 %v788_v0 }
 0x36c   : > { %v1327_v1 = vpop.eup %1326 }
 0x36d   : > { %v790_v2 = vsel %vm602_vm2, %v1327_v1, 0.0 }
 0x36e   : > { %791 = vadd.xlane.f32.xlu1 %v790_v2 }
 0x374   : > { %v741_v3 = vpop.permute.xlu0 %740 }
 0x375   : > { %v746_v4 = vsel %vm619_vm1, %v741_v3, 0 }
 0x376   : > { %682 = vrot.lane.b32.xlu2 %v681_v51, %s1403_s27  ;;  %755 = vmatpush.bf16.msra.mxu2 %v746_v4 }
 0x387   : > { %798 = vrot.lane.b32.xlu1 %v681_v51, %s1404_s18 }
 0x3c9   : > { %v734_v5 = vpop.xlane.xlu1 %733 }
 0x3ca   : > { %1328 = vrcp.f32 %v734_v5 }
 0x3d0   : > { %v1329_v6 = vpop.eup %1328 }
 0x3d1   : > { %v736_v7 = vmul.f32 %v1329_v6, %v1323_v57  ;;  %v673_v8 = vpop.xlane.xlu2 %672 }
 0x3d2   : > { %1330 = vrcp.f32 %v673_v8 }
 0x3d3   : > { %1196 = vst.msk [vmem:[%s1668_s11 + $0x10] sm:$0xff] %vm602_vm2, %v736_v7  ;;  %v739_v9 = vpack.c.bf16 %v736_v7, %v736_v7 }
 0x3d5   : > { %1197 = vmatmul.msk.bf16.vlgmr.msra.gmra.mxu2 %vm602_vm2, %v739_v9 }
 0x3d8   : > { %v1331_v10 = vpop.eup %1330 }
 0x3d9   : > { %v675_v11 = vmul.f32 %v1331_v10, %v1325_v60  ;;  %v683_v12 = vpop.permute.xlu2 %682 }
 0x3da   : > { %v688_v13 = vsel %vm619_vm1, %v683_v12, 0 }
 0x3db   : > { %1193 = vst.msk [vmem:[%s1668_s11 + $0x8] sm:$0xff] %vm602_vm2, %v675_v11  ;;  %697 = vmatpush.bf16.msrb.mxu0 %v688_v13  ;;  %v678_v14 = vpack.c.bf16 %v675_v11, %v675_v11 }
 0x3de   : > { %1194 = vmatmul.msk.bf16.vlgmr.msrb.gmra.mxu0 %vm602_vm2, %v678_v14 }
 0x3e1   : > { %v792_v15 = vpop.xlane.xlu1 %791 }
 0x3e2   : > { %1332 = vrcp.f32 %v792_v15 }
 0x3e3   : > { %1334 = vrcp.f32 %v1405_v46 }
 0x3e8   : > { %v1333_v16 = vpop.eup %1332 }
 0x3e9   : > { %v794_v17 = vmul.f32 %v1333_v16, %v1327_v1  ;;  %v1335_v47 = vpop.eup %1334 }
 0x3ea   : > { %v917_v49 = vmul.f32 128.0, %v1335_v47  ;;  %vm921_vm5 = vweird.f32 %v1335_v47 }
 0x3eb   : > { %1199 = vst.msk [vmem:[%s1668_s11 + $0x18] sm:$0xff] %vm602_vm2, %v794_v17  ;;  %v797_v20 = vpack.c.bf16 %v794_v17, %v794_v17 }
 0x3ec   : > { %v918_v50 = vsub.f32 1.0, %v917_v49 }
 0x3ee   : > { %v919_v51 = vmul.f32 %v1335_v47, %v918_v50 }
 0x3f9   : > { %v799_v18 = vpop.permute.xlu1 %798 }
 0x3fa   : > { %v804_v19 = vsel %vm619_vm1, %v799_v18, 0 }
 0x3fb   : > { %813 = vmatpush.bf16.msra.mxu0 %v804_v19 }
 0x3fe   : > { %1200 = vmatmul.msk.bf16.vlgmr.msra.gmra.mxu0 %vm602_vm2, %v797_v20 }
 0x458   : > { %v757_v21 = vpop.f32.mrf.mxu2 }
 0x45b   : > { %v699_v22 = vpop.f32.mrf.mxu0 }
 0x45c   : > { %820 = vrot.lane.b32.xlu2 %v699_v22, %s1404_s18  ;;  %s1270_s18 = sshll.u32 %s1479_s13, 5  ;;  %s1358_s13 = scalar_lea.hbm %s1784_s9, 64 }
 0x460   : > { %v759_v23 = vpop.f32.mrf.mxu2 }
 0x463   : > { %v701_v24 = vpop.f32.mrf.mxu0 }
 0x464   : > { %824 = vrot.lane.b32.xlu2 %v757_v21, %s1402_s26 }
 0x47b   : > { %v815_v25 = vpop.f32.mrf.mxu0 }
 0x47c   : > { %828 = vrot.lane.b32.xlu0 %v815_v25, %s1403_s27  ;;  %s971_s27 = scalar_lea.hbm %s1784_s9, %s1270_s18 }
 0x47d   : > { %s974_s23 = sshll.u32 %s971_s27, 4  ;;  %s975_s23 = int_to_ptr.hbm [resolvable:$true] %s974_s23 }
 0x47e   : > { %s1352_s24 = sshra.s32 %s975_s23, 4  ;;  %s1353_s24 = int_to_ptr.hbm [resolvable:$true] %s1352_s24 }
 0x47f   : > { %s1354_s25 = scalar_lea.hbm %s1353_s24, 32  ;;  %p1359_p0 = scmp.lt.s32.totalorder %s1353_s24, %s1784_s9 }
 0x480   : > { %p1355_p11 = scmp.ne.s32.totalorder %s1353_s24, %s1354_s25  ;;  %p1360_p1 = scmp.lt.s32.totalorder %s1358_s13, %s1354_s25 }
 0x482   : > { %p1356_p12 = pnand %p1355_p11, %p1496_p5  ;;  %p1361_p2 = por %p1360_p1, %p1359_p0 }
 0x483   : > { %v817_v26 = vpop.f32.mrf.mxu0 }
 0x484   : > { %p1357_p13 = pneg %p1356_p12 }
 0x486   : > { %p1362_p3 = pnand %p1361_p2, %p1357_p13 }
 0x4b6   : > { %v821_v36 = vpop.permute.xlu2 %820 }
 0x4b7   : > { %v831_v38 = vsel %vm582_vm0, %v1677_v35, %v821_v36  ;;  %v920_v35 = vadd.f32 %v1335_v47, %v919_v51 }
 0x4b9   : > { %v922_v52 = vsel %vm921_vm5, %v1335_v47, %v920_v35 }
 0x4be   : > { %v825_v37 = vpop.permute.xlu2 %824 }
 0x4bf   : > { %v833_v39 = vsel %vm832_vm3, %v831_v38, %v825_v37 }
 0x4ee   : > { %v829_v40 = vpop.permute.xlu0 %828 }
 0x4ef   : > { %v835_v41 = vsel %vm834_vm4, %v833_v39, %v829_v40 }
 0x4f0   : > { %v836_v42 = vpack.c.bf16 %v835_v41, %v835_v41 }
 0x4f2   : > { %909 = vmatmul.bf16.vlgmr.msrb.gmra.mxu1 %v836_v42 }
 0x56f   : > { %v910_v43 = vpop.f32.mrf.mxu1 }
 0x570   : > { %v911_v44 = vadd.f32 %v910_v43, %v1629_v48 }
 0x572   : > { %914 = vadd.xlane.f32.xlu2 %v911_v44 }
 0x577   : > { %v912_v45 = vpop.f32.mrf.mxu1 }
 0x5e5   : > { %v915_v53 = vpop.xlane.xlu2 %914 }
 0x5e6   : > { %v923_v54 = vmul.f32 %v922_v52, %v915_v53 }
 0x5e8   : > { %v924_v55 = vsub.f32 %v911_v44, %v923_v54 }
 0x5ea   : > { %v925_v56 = vmul.f32 %v924_v55, %v924_v55 }
 0x5ec   : > { %926 = vadd.xlane.f32.xlu0 %v925_v56 }
 0x5ed   : > { %1365 = shalt.err (!%p1362_p3)
}
 0x5ee   : > { %s1406_s16 = smov 128   ;;  %s1407_s11 = smov 8   ;;  %v1316_v1 = vld [vmem:[%s1781_s6] ss:$0 sm:$0xff] }
 0x5ef   : > { %1271 = dma.vmem_to_hbm [thread:$0]  (%p1496_p5), %s973_s22, 512, %s975_s23, %s957_s28, %s1406_s16, %s1406_s16, %s1407_s11  }
 0x5f0   : > { %v1317_v3 = vld [vmem:[%s1782_s7] ss:$0 sm:$0xff]  ;;  %s372_s23 = scalar_lea.vmem %s1783_s8, %s1595_s14 }
 0x65f   : > { %v927_v48 = vpop.xlane.xlu0 %926 }
 0x660   : > { %v928_v57 = vmul.f32 %v927_v48, %v922_v52 }
 0x662   : > { %v929_v58 = vadd.f32 1e-05, %v928_v57 }
 0x664   : > { %1336 = vrsqrt.f32 %v929_v58  ;;  %vm936_vm7 = vweird.f32 %v929_v58 }
 0x66a   : > { %v1337_v59 = vpop.eup %1336 }
 0x66b   : > { %v931_v60 = vmul.f32 %v1337_v59, %v929_v58  ;;  %vm937_vm6 = vweird.f32 %v1337_v59 }
 0x66c   : > { %vm938_vm8 = vmor %vm936_vm7, %vm937_vm6 }
 0x66d   : > { %v932_v61 = vmul.f32 %v1337_v59, %v931_v60 }
 0x66f   : > { %v933_v62 = vmul.f32 0.5, %v932_v61 }
 0x671   : > { %v934_v63 = vsub.f32 1.5, %v933_v62 }
 0x673   : > { %v935_v0 = vmul.f32 %v1337_v59, %v934_v63 }
 0x675   : > { %v939_v2 = vsel %vm938_vm8, %v1337_v59, %v935_v0 }
 0x676   : > { %v940_v4 = vmul.f32 %v939_v2, %v924_v55 }
 0x678   : > { %v945_v5 = vmul.f32 %v1316_v1, %v940_v4 }
 0x67a   : > { %v950_v6 = vadd.f32 %v1317_v3, %v945_v5 }
 0x67c   : > { %951 = vst [vmem:[%s372_s23] sm:$0xff] %v950_v6 }
 0x67d PF: > { %p1277_p4 = scmp.ge.s32.totalorder %s1400_s12, 2  ;;  %s996_s28 = sand.u32 1, %s1388_s30  }
 0x67e   : > { %s997_s24 = scalar_lea.sflag [#allocation3], %s996_s28 }
 0x67f   : > { %p1274_p5 = pnand %p1277_p4, %p1500_p6 }
 0x681   : > { %p1275_p7 = pneg %p1274_p5 }
 0x683   : > { %1383 = dma.done.wait (%p1275_p7), %s997_s24, 512  }
 0x684   : > { %1385 = vsyncadd (%p1275_p7), %s997_s24, 4294966784  ;;  %s1792_s25 = sld [smem:[#allocation5_spill]]  ;;  %p20_p8 = scmp.ge.s32.totalorder %s1483_s15, 4  }
 0x685   : > { %s1793_s11 = sld [smem:[#allocation6_spill]]  ;;  %s1794_s30 = smov %s1392_s10 }
 0x686   : > { %s1796_s12 = smov %s1483_s15  ;;  %22 = sbr.rel (!%p20_p8) target bundleno = 5 (0x5), region = 108 }
 0x68a   : > { %s1795_s10 = smov %s1792_s25 }
 0x68b   :  { %1003 = vsyncpa [#allocation3], 1 }
 0x68c   :  { %1005 = vsyncpa [#allocation3 + $0x1], 1 }

</bundles_post_ra>
